<compile_context>
chip_gen: v7x
topology: tpu7x:2x2x1
jax: 0.10.0
libtpu: 0.0.40
codegen_flags: <defaults>
</compile_context>

<pallas_src>
import math
from functools import partial

import jax
import jax.numpy as jnp
from jax.experimental import pallas as pl
from jax.experimental.pallas import tpu as pltpu


def _layer_norm(v, g, b, eps=1e-5):
    mu = jnp.mean(v, axis=-1, keepdims=True)
    var = jnp.mean((v - mu) ** 2, axis=-1, keepdims=True)
    return (v - mu) * jax.lax.rsqrt(var + eps) * g + b


def _encoder_kernel(
    x_ref, kb_ref,
    wqkv_ref, bqkv_ref, wo_ref, bo_ref,
    ln1g_ref, ln1b_ref, fc1w_ref, fc1b_ref, fc2w_ref, fc2b_ref,
    ln2g_ref, ln2b_ref, lnfg_ref, lnfb_ref,
    out_ref,
    *, n_layers, n_heads, head_dim, normalize_before,
):
    TB, S, D = x_ref.shape
    rows = TB * S

    # Pre-masked + position-encoded input; flatten rows for row-pointwise matmuls.
    x = x_ref[...].astype(jnp.float32).reshape(rows, D)
    key_bias = kb_ref[...].astype(jnp.float32)            # (TB, 1, S); 0 valid, -1e30 pad

    scale = 1.0 / math.sqrt(head_dim)

    for l in range(n_layers):                              # static unroll (small L)
        # ---------------- self-attention sub-block ----------------
        residual = x
        h = _layer_norm(x, ln1g_ref[l], ln1b_ref[l]) if normalize_before else x

        # Fused QKV projection: one MXU matmul with N = 3D.
        qkv = jnp.dot(h.astype(jnp.bfloat16), wqkv_ref[l],
                      preferred_element_type=jnp.float32) + bqkv_ref[l]
        q = qkv[:, :D] * scale
        k = qkv[:, D:2 * D]
        v = qkv[:, 2 * D:]

        q3 = q.reshape(TB, S, D)
        k3 = k.reshape(TB, S, D)
        v3 = v.reshape(TB, S, D)

        # Batched-over-batch attention; short static loop over heads only for the
        # score/softmax/context part (no per-head projections or accumulations).
        head_ctx = []
        for hh in range(n_heads):
            lo = hh * head_dim
            qs = q3[:, :, lo:lo + head_dim]
            ks = k3[:, :, lo:lo + head_dim]
            vs = v3[:, :, lo:lo + head_dim]
            sc = jnp.einsum('bqd,bkd->bqk', qs, ks,
                            preferred_element_type=jnp.float32) + key_bias
            sc = sc - jnp.max(sc, axis=-1, keepdims=True)
            e = jnp.exp(sc)
            p = e * pl.reciprocal(jnp.sum(e, axis=-1, keepdims=True), approx=True)
            head_ctx.append(jnp.einsum('bqk,bkd->bqd', p, vs,
                                       preferred_element_type=jnp.float32))

        # Heads are contiguous along D: concat then one full-width W_o matmul.
        ctx = jnp.concatenate(head_ctx, axis=-1).reshape(rows, D)
        attn = jnp.dot(ctx.astype(jnp.bfloat16), wo_ref[l],
                       preferred_element_type=jnp.float32) + bo_ref[l]

        # dropout == identity at inference
        x = residual + attn
        if not normalize_before:
            x = _layer_norm(x, ln1g_ref[l], ln1b_ref[l])

        # ---------------- feed-forward sub-block ----------------
        residual = x
        h = _layer_norm(x, ln2g_ref[l], ln2b_ref[l]) if normalize_before else x
        h = jnp.maximum(
            jnp.dot(h.astype(jnp.bfloat16), fc1w_ref[l],
                    preferred_element_type=jnp.float32) + fc1b_ref[l], 0.0)
        h = jnp.dot(h.astype(jnp.bfloat16), fc2w_ref[l],
                    preferred_element_type=jnp.float32) + fc2b_ref[l]
        x = residual + h
        if not normalize_before:
            x = _layer_norm(x, ln2g_ref[l], ln2b_ref[l])

    if normalize_before:
        x = _layer_norm(x, lnfg_ref[...], lnfb_ref[...])

    # Write the (S, TB, D) output block directly (module output layout).
    x3 = x.reshape(TB, S, D).astype(out_ref.dtype)
    for b in range(TB):
        out_ref[:, b, :] = x3[b]


def sent_transformer_encoder(top_vecs, mask, params, *, n_heads,
                             normalize_before=True, block_batch=None):
    """top_vecs: (B, S, D) float32, mask: (B, S) bool/float.

    Returns {'encoder_out': (S, B, D), 'encoder_padding_mask': (B, S) bool}.
    """
    B, S, D = top_vecs.shape
    L = params["wq"].shape[0]
    F = params["fc1_w"].shape[-1]
    head_dim = D // n_heads

    TB = B if block_batch is None else block_batch
    assert B % TB == 0
    # (8,128) block rule for the (S, TB, D) output block: TB must span the full
    # batch or be sublane-aligned.
    assert TB == B or TB % 8 == 0

    mask_f = mask.astype(jnp.float32)
    # x = top_vecs * mask[:, :, None] + pe[:, :n_sents]   (one fused XLA
    # elementwise op; keeps padded sub-(8,128) mask columns out of the kernel)
    x0 = top_vecs.astype(jnp.float32) * mask_f[:, :, None] + params["pe"][None, :S, :]
    # encoder_padding_mask = ~mask  -> additive key bias (0 valid, -1e30 padded)
    key_bias = (mask_f[:, None, :] - 1.0) * 1e30           # (B, 1, S)

    # Fused QKV weights; matmul operands stored as bf16 (f32 accumulation in-kernel).
    bf16 = lambda a: a.astype(jnp.bfloat16)
    wqkv = bf16(jnp.concatenate([params["wq"], params["wk"], params["wv"]], axis=-1))
    bqkv = jnp.concatenate([params["bq"], params["bk"], params["bv"]], axis=-1)
    wo = bf16(params["wo"])
    fc1w = bf16(params["fc1_w"])
    fc2w = bf16(params["fc2_w"])

    kernel = partial(_encoder_kernel, n_layers=L, n_heads=n_heads,
                     head_dim=head_dim, normalize_before=normalize_before)

    def full(shape):
        return pl.BlockSpec(shape, lambda b, _s=len(shape): (0,) * _s)

    in_specs = [
        pl.BlockSpec((TB, S, D), lambda b: (b, 0, 0)),   # pre-masked + pos-encoded x
        pl.BlockSpec((TB, 1, S), lambda b: (b, 0, 0)),   # additive key bias
        full((L, D, 3 * D)), full((L, 3 * D)),           # wqkv, bqkv
        full((L, D, D)), full((L, D)),                   # wo, bo
        full((L, D)), full((L, D)),                      # attn-LN gamma/beta
        full((L, D, F)), full((L, F)),                   # fc1 w/b
        full((L, F, D)), full((L, D)),                   # fc2 w/b
        full((L, D)), full((L, D)),                      # ffn-LN gamma/beta
        full((1, D)), full((1, D)),                      # final LN gamma/beta
    ]

    encoder_out = pl.pallas_call(
        kernel,
        out_shape=jax.ShapeDtypeStruct((S, B, D), top_vecs.dtype),
        grid=(B // TB,),
        in_specs=in_specs,
        out_specs=pl.BlockSpec((S, TB, D), lambda b: (0, b, 0)),
        compiler_params=pltpu.CompilerParams(
            dimension_semantics=("parallel",),
            vmem_limit_bytes=32 * 1024 * 1024,
        ),
    )(x0, key_bias, wqkv, bqkv, wo, params["bo"],
      params["ln1_g"], params["ln1_b"],
      fc1w, params["fc1_b"], fc2w, params["fc2_b"],
      params["ln2_g"], params["ln2_b"],
      params["lnf_g"], params["lnf_b"])

    encoder_padding_mask = jnp.logical_not(mask.astype(bool))
    return {"encoder_out": encoder_out, "encoder_padding_mask": encoder_padding_mask}


def init_params(key, n_layers, embed_dim, ffn_dim, max_len=512):
    """Deterministic synthetic parameters (weights stored in (in, out) layout)."""
    ks = jax.random.split(key, 6)

    def w(k, shape, scale=0.02):
        return (scale * jax.random.normal(k, shape)).astype(jnp.float32)

    L, D, F = n_layers, embed_dim, ffn_dim
    params = dict(
        wq=w(ks[0], (L, D, D)), bq=jnp.zeros((L, D), jnp.float32),
        wk=w(ks[1], (L, D, D)), bk=jnp.zeros((L, D), jnp.float32),
        wv=w(ks[2], (L, D, D)), bv=jnp.zeros((L, D), jnp.float32),
        wo=w(ks[3], (L, D, D)), bo=jnp.zeros((L, D), jnp.float32),
        ln1_g=jnp.ones((L, D), jnp.float32), ln1_b=jnp.zeros((L, D), jnp.float32),
        fc1_w=w(ks[4], (L, D, F)), fc1_b=jnp.zeros((L, F), jnp.float32),
        fc2_w=w(ks[5], (L, F, D)), fc2_b=jnp.zeros((L, D), jnp.float32),
        ln2_g=jnp.ones((L, D), jnp.float32), ln2_b=jnp.zeros((L, D), jnp.float32),
        lnf_g=jnp.ones((1, D), jnp.float32), lnf_b=jnp.zeros((1, D), jnp.float32),
    )
    # Sinusoidal PositionalEncoding.pe (max_len, D)
    position = jnp.arange(max_len, dtype=jnp.float32)[:, None]
    div_term = jnp.exp(jnp.arange(0, D, 2, dtype=jnp.float32) * -(math.log(10000.0) / D))
    pe = jnp.zeros((max_len, D), jnp.float32)
    pe = pe.at[:, 0::2].set(jnp.sin(position * div_term))
    pe = pe.at[:, 1::2].set(jnp.cos(position * div_term))
    params["pe"] = pe
    return params


if __name__ == "__main__":
    # args: encoder_layers=2, encoder_embed_dim=32, heads=4, ffn=64,
    #       sent_pos_emb_enc=True, encoder_normalize_before=True, dropout=0.1 (eval)
    B, S, D, H, F, L = 2, 8, 32, 4, 64, 2

    key = jax.random.PRNGKey(0)
    k_x, k_p = jax.random.split(key)
    top_vecs = jax.random.normal(k_x, (B, S, D), dtype=jnp.float32)
    lengths = jnp.array([8, 5])
    mask = jnp.arange(S)[None, :] < lengths[:, None]          # (B, S) bool

    params = init_params(k_p, L, D, F)

    out = sent_transformer_encoder(top_vecs, mask, params,
                                   n_heads=H, normalize_before=True)
    jax.block_until_ready(out["encoder_out"])

    assert out["encoder_out"].shape == (S, B, D)
    assert out["encoder_padding_mask"].shape == (B, S)
    assert not bool(jnp.any(jnp.isnan(out["encoder_out"])))
    print("KERNEL_OK")
</pallas_src>

<mosaic_0001>
module attributes {stable_mosaic.version = 11 : i64} {
  func.func @_encoder_kernel(%arg0: i32, %arg1: memref<2x8x32xf32, #tpu.memory_space<vmem>>, %arg2: memref<2x1x8xf32, #tpu.memory_space<vmem>>, %arg3: memref<2x32x96xbf16, #tpu.memory_space<vmem>>, %arg4: memref<2x96xf32, #tpu.memory_space<vmem>>, %arg5: memref<2x32x32xbf16, #tpu.memory_space<vmem>>, %arg6: memref<2x32xf32, #tpu.memory_space<vmem>>, %arg7: memref<2x32xf32, #tpu.memory_space<vmem>>, %arg8: memref<2x32xf32, #tpu.memory_space<vmem>>, %arg9: memref<2x32x64xbf16, #tpu.memory_space<vmem>>, %arg10: memref<2x64xf32, #tpu.memory_space<vmem>>, %arg11: memref<2x64x32xbf16, #tpu.memory_space<vmem>>, %arg12: memref<2x32xf32, #tpu.memory_space<vmem>>, %arg13: memref<2x32xf32, #tpu.memory_space<vmem>>, %arg14: memref<2x32xf32, #tpu.memory_space<vmem>>, %arg15: memref<1x32xf32, #tpu.memory_space<vmem>>, %arg16: memref<1x32xf32, #tpu.memory_space<vmem>>, %arg17: memref<8x2x32xf32, #tpu.memory_space<vmem>>) attributes {dimension_semantics = [#tpu.dimension_semantics<parallel>], iteration_bounds = array<i64: 1>, scalar_prefetch = 0 : i64, scratch_operands = 0 : i64, tpu.core_type = #tpu.core_type<tc>, window_params = [{transform_indices = @transform_0, window_bounds = array<i64: 2, 8, 32>}, {transform_indices = @transform_1, window_bounds = array<i64: 2, 1, 8>}, {pipeline_mode = #tpu.pipeline_mode<synchronous>, transform_indices = @transform_2, window_bounds = array<i64: 2, 32, 96>}, {pipeline_mode = #tpu.pipeline_mode<synchronous>, transform_indices = @transform_3, window_bounds = array<i64: 2, 96>}, {pipeline_mode = #tpu.pipeline_mode<synchronous>, transform_indices = @transform_4, window_bounds = array<i64: 2, 32, 32>}, {pipeline_mode = #tpu.pipeline_mode<synchronous>, transform_indices = @transform_5, window_bounds = array<i64: 2, 32>}, {pipeline_mode = #tpu.pipeline_mode<synchronous>, transform_indices = @transform_6, window_bounds = array<i64: 2, 32>}, {pipeline_mode = #tpu.pipeline_mode<synchronous>, transform_indices = @transform_7, window_bounds = array<i64: 2, 32>}, {pipeline_mode = #tpu.pipeline_mode<synchronous>, transform_indices = @transform_8, window_bounds = array<i64: 2, 32, 64>}, {pipeline_mode = #tpu.pipeline_mode<synchronous>, transform_indices = @transform_9, window_bounds = array<i64: 2, 64>}, {pipeline_mode = #tpu.pipeline_mode<synchronous>, transform_indices = @transform_10, window_bounds = array<i64: 2, 64, 32>}, {pipeline_mode = #tpu.pipeline_mode<synchronous>, transform_indices = @transform_11, window_bounds = array<i64: 2, 32>}, {pipeline_mode = #tpu.pipeline_mode<synchronous>, transform_indices = @transform_12, window_bounds = array<i64: 2, 32>}, {pipeline_mode = #tpu.pipeline_mode<synchronous>, transform_indices = @transform_13, window_bounds = array<i64: 2, 32>}, {pipeline_mode = #tpu.pipeline_mode<synchronous>, transform_indices = @transform_14, window_bounds = array<i64: 1, 32>}, {pipeline_mode = #tpu.pipeline_mode<synchronous>, transform_indices = @transform_15, window_bounds = array<i64: 1, 32>}, {transform_indices = @transform_16, window_bounds = array<i64: 8, 2, 32>}]} {
    %c0 = arith.constant 0 : index
    %c0_0 = arith.constant 0 : index
    %c0_1 = arith.constant 0 : index
    %0 = vector.load %arg1[%c0, %c0_0, %c0_1] : memref<2x8x32xf32, #tpu.memory_space<vmem>>, vector<2x8x32xf32>
    %1 = vector.shape_cast %0 : vector<2x8x32xf32> to vector<16x32xf32>
    %c0_2 = arith.constant 0 : index
    %c0_3 = arith.constant 0 : index
    %c0_4 = arith.constant 0 : index
    %2 = vector.load %arg2[%c0_2, %c0_3, %c0_4] : memref<2x1x8xf32, #tpu.memory_space<vmem>>, vector<2x1x8xf32>
    %c0_5 = arith.constant 0 : index
    %c0_6 = arith.constant 0 : index
    %3 = vector.load %arg7[%c0_5, %c0_6] : memref<2x32xf32, #tpu.memory_space<vmem>>, vector<1x32xf32>
    %4 = vector.shape_cast %3 : vector<1x32xf32> to vector<32xf32>
    %c0_7 = arith.constant 0 : index
    %c0_8 = arith.constant 0 : index
    %5 = vector.load %arg8[%c0_7, %c0_8] : memref<2x32xf32, #tpu.memory_space<vmem>>, vector<1x32xf32>
    %6 = vector.shape_cast %5 : vector<1x32xf32> to vector<32xf32>
    %cst = arith.constant dense<0.000000e+00> : vector<16xf32>
    %7 = vector.multi_reduction <add>, %1, %cst [1] : vector<16x32xf32> to vector<16xf32>
    %8 = vector.shape_cast %7 : vector<16xf32> to vector<16x1xf32>
    %cst_9 = arith.constant 3.200000e+01 : f32
    %9 = vector.broadcast %cst_9 : f32 to vector<16x1xf32>
    %10 = arith.divf %8, %9 : vector<16x1xf32>
    %11 = vector.broadcast %10 : vector<16x1xf32> to vector<16x32xf32>
    %12 = arith.subf %1, %11 : vector<16x32xf32>
    %13 = arith.mulf %12, %12 : vector<16x32xf32>
    %cst_10 = arith.constant dense<0.000000e+00> : vector<16xf32>
    %14 = vector.multi_reduction <add>, %13, %cst_10 [1] : vector<16x32xf32> to vector<16xf32>
    %15 = vector.shape_cast %14 : vector<16xf32> to vector<16x1xf32>
    %cst_11 = arith.constant 3.200000e+01 : f32
    %16 = vector.broadcast %cst_11 : f32 to vector<16x1xf32>
    %17 = arith.divf %15, %16 : vector<16x1xf32>
    %18 = vector.broadcast %10 : vector<16x1xf32> to vector<16x32xf32>
    %19 = arith.subf %1, %18 : vector<16x32xf32>
    %cst_12 = arith.constant 9.99999974E-6 : f32
    %20 = vector.broadcast %cst_12 : f32 to vector<16x1xf32>
    %21 = arith.addf %17, %20 : vector<16x1xf32>
    %22 = math.rsqrt %21 : vector<16x1xf32>
    %23 = vector.broadcast %22 : vector<16x1xf32> to vector<16x32xf32>
    %24 = arith.mulf %19, %23 : vector<16x32xf32>
    %25 = vector.shape_cast %4 : vector<32xf32> to vector<1x32xf32>
    %26 = vector.broadcast %25 : vector<1x32xf32> to vector<16x32xf32>
    %27 = arith.mulf %24, %26 : vector<16x32xf32>
    %28 = vector.shape_cast %6 : vector<32xf32> to vector<1x32xf32>
    %29 = vector.broadcast %28 : vector<1x32xf32> to vector<16x32xf32>
    %30 = arith.addf %27, %29 : vector<16x32xf32>
    %31 = arith.truncf %30 : vector<16x32xf32> to vector<16x32xbf16>
    %c0_13 = arith.constant 0 : index
    %c0_14 = arith.constant 0 : index
    %c0_15 = arith.constant 0 : index
    %32 = vector.load %arg3[%c0_13, %c0_14, %c0_15] : memref<2x32x96xbf16, #tpu.memory_space<vmem>>, vector<1x32x96xbf16>
    %33 = vector.shape_cast %32 : vector<1x32x96xbf16> to vector<32x96xbf16>
    %cst_16 = arith.constant dense<0.000000e+00> : vector<16x96xf32>
    %34 = tpu.matmul %31, %33, %cst_16 {dimension_numbers = #tpu.dot_dimension_numbers<[1], [0], [0], [1], [0, 0, 1, 1], [], []>} : vector<16x32xbf16>, vector<32x96xbf16>, vector<16x96xf32> -> vector<16x96xf32>
    %c0_17 = arith.constant 0 : index
    %c0_18 = arith.constant 0 : index
    %35 = vector.load %arg4[%c0_17, %c0_18] : memref<2x96xf32, #tpu.memory_space<vmem>>, vector<1x96xf32>
    %36 = vector.shape_cast %35 : vector<1x96xf32> to vector<96xf32>
    %37 = vector.shape_cast %36 : vector<96xf32> to vector<1x96xf32>
    %38 = vector.broadcast %37 : vector<1x96xf32> to vector<16x96xf32>
    %39 = arith.addf %34, %38 : vector<16x96xf32>
    %40 = vector.extract_strided_slice %39 {offsets = [0, 0], sizes = [16, 32], strides = [1, 1]} : vector<16x96xf32> to vector<16x32xf32>
    %cst_19 = arith.constant 0.353553385 : f32
    %41 = vector.broadcast %cst_19 : f32 to vector<16x32xf32>
    %42 = arith.mulf %40, %41 : vector<16x32xf32>
    %43 = vector.extract_strided_slice %39 {offsets = [0, 32], sizes = [16, 32], strides = [1, 1]} : vector<16x96xf32> to vector<16x32xf32>
    %44 = vector.extract_strided_slice %39 {offsets = [0, 64], sizes = [16, 32], strides = [1, 1]} : vector<16x96xf32> to vector<16x32xf32>
    %45 = vector.shape_cast %42 : vector<16x32xf32> to vector<2x8x32xf32>
    %46 = vector.shape_cast %43 : vector<16x32xf32> to vector<2x8x32xf32>
    %47 = vector.shape_cast %44 : vector<16x32xf32> to vector<2x8x32xf32>
    %48 = vector.extract_strided_slice %45 {offsets = [0, 0, 0], sizes = [2, 8, 8], strides = [1, 1, 1]} : vector<2x8x32xf32> to vector<2x8x8xf32>
    %49 = vector.extract_strided_slice %46 {offsets = [0, 0, 0], sizes = [2, 8, 8], strides = [1, 1, 1]} : vector<2x8x32xf32> to vector<2x8x8xf32>
    %50 = vector.extract_strided_slice %47 {offsets = [0, 0, 0], sizes = [2, 8, 8], strides = [1, 1, 1]} : vector<2x8x32xf32> to vector<2x8x8xf32>
    "tpu.trace_start"() <{level = 10 : i32, message = "bqd,bkd->bqk"}> : () -> ()
    %cst_20 = arith.constant dense<0.000000e+00> : vector<2x8x8xf32>
    %51 = tpu.matmul %48, %49, %cst_20 {dimension_numbers = #tpu.dot_dimension_numbers<[2], [2], [1], [1], [0, 0, 0, 1, 1, 1], [0], [0]>} : vector<2x8x8xf32>, vector<2x8x8xf32>, vector<2x8x8xf32> -> vector<2x8x8xf32>
    "tpu.trace_stop"() : () -> ()
    %52 = vector.broadcast %2 : vector<2x1x8xf32> to vector<2x8x8xf32>
    %53 = arith.addf %51, %52 : vector<2x8x8xf32>
    %cst_21 = arith.constant dense<0xFF800000> : vector<2x8xf32>
    %54 = vector.multi_reduction <maximumf>, %53, %cst_21 [2] : vector<2x8x8xf32> to vector<2x8xf32>
    %55 = vector.shape_cast %54 : vector<2x8xf32> to vector<2x8x1xf32>
    %56 = vector.broadcast %55 : vector<2x8x1xf32> to vector<2x8x8xf32>
    %57 = arith.subf %53, %56 : vector<2x8x8xf32>
    %58 = math.exp %57 : vector<2x8x8xf32>
    %cst_22 = arith.constant dense<0.000000e+00> : vector<2x8xf32>
    %59 = vector.multi_reduction <add>, %58, %cst_22 [2] : vector<2x8x8xf32> to vector<2x8xf32>
    %60 = vector.shape_cast %59 : vector<2x8xf32> to vector<2x8x1xf32>
    %61 = tpu.reciprocal %60 {approx = true} : vector<2x8x1xf32> -> vector<2x8x1xf32>
    %62 = vector.broadcast %61 : vector<2x8x1xf32> to vector<2x8x8xf32>
    %63 = arith.mulf %58, %62 : vector<2x8x8xf32>
    "tpu.trace_start"() <{level = 10 : i32, message = "bqk,bkd->bqd"}> : () -> ()
    %cst_23 = arith.constant dense<0.000000e+00> : vector<2x8x8xf32>
    %64 = tpu.matmul %63, %50, %cst_23 {dimension_numbers = #tpu.dot_dimension_numbers<[2], [1], [1], [2], [0, 0, 0, 1, 1, 2], [0], [0]>} : vector<2x8x8xf32>, vector<2x8x8xf32>, vector<2x8x8xf32> -> vector<2x8x8xf32>
    "tpu.trace_stop"() : () -> ()
    %65 = vector.extract_strided_slice %45 {offsets = [0, 0, 8], sizes = [2, 8, 8], strides = [1, 1, 1]} : vector<2x8x32xf32> to vector<2x8x8xf32>
    %66 = vector.extract_strided_slice %46 {offsets = [0, 0, 8], sizes = [2, 8, 8], strides = [1, 1, 1]} : vector<2x8x32xf32> to vector<2x8x8xf32>
    %67 = vector.extract_strided_slice %47 {offsets = [0, 0, 8], sizes = [2, 8, 8], strides = [1, 1, 1]} : vector<2x8x32xf32> to vector<2x8x8xf32>
    "tpu.trace_start"() <{level = 10 : i32, message = "bqd,bkd->bqk"}> : () -> ()
    %cst_24 = arith.constant dense<0.000000e+00> : vector<2x8x8xf32>
    %68 = tpu.matmul %65, %66, %cst_24 {dimension_numbers = #tpu.dot_dimension_numbers<[2], [2], [1], [1], [0, 0, 0, 1, 1, 1], [0], [0]>} : vector<2x8x8xf32>, vector<2x8x8xf32>, vector<2x8x8xf32> -> vector<2x8x8xf32>
    "tpu.trace_stop"() : () -> ()
    %69 = vector.broadcast %2 : vector<2x1x8xf32> to vector<2x8x8xf32>
    %70 = arith.addf %68, %69 : vector<2x8x8xf32>
    %cst_25 = arith.constant dense<0xFF800000> : vector<2x8xf32>
    %71 = vector.multi_reduction <maximumf>, %70, %cst_25 [2] : vector<2x8x8xf32> to vector<2x8xf32>
    %72 = vector.shape_cast %71 : vector<2x8xf32> to vector<2x8x1xf32>
    %73 = vector.broadcast %72 : vector<2x8x1xf32> to vector<2x8x8xf32>
    %74 = arith.subf %70, %73 : vector<2x8x8xf32>
    %75 = math.exp %74 : vector<2x8x8xf32>
    %cst_26 = arith.constant dense<0.000000e+00> : vector<2x8xf32>
    %76 = vector.multi_reduction <add>, %75, %cst_26 [2] : vector<2x8x8xf32> to vector<2x8xf32>
    %77 = vector.shape_cast %76 : vector<2x8xf32> to vector<2x8x1xf32>
    %78 = tpu.reciprocal %77 {approx = true} : vector<2x8x1xf32> -> vector<2x8x1xf32>
    %79 = vector.broadcast %78 : vector<2x8x1xf32> to vector<2x8x8xf32>
    %80 = arith.mulf %75, %79 : vector<2x8x8xf32>
    "tpu.trace_start"() <{level = 10 : i32, message = "bqk,bkd->bqd"}> : () -> ()
    %cst_27 = arith.constant dense<0.000000e+00> : vector<2x8x8xf32>
    %81 = tpu.matmul %80, %67, %cst_27 {dimension_numbers = #tpu.dot_dimension_numbers<[2], [1], [1], [2], [0, 0, 0, 1, 1, 2], [0], [0]>} : vector<2x8x8xf32>, vector<2x8x8xf32>, vector<2x8x8xf32> -> vector<2x8x8xf32>
    "tpu.trace_stop"() : () -> ()
    %82 = vector.extract_strided_slice %45 {offsets = [0, 0, 16], sizes = [2, 8, 8], strides = [1, 1, 1]} : vector<2x8x32xf32> to vector<2x8x8xf32>
    %83 = vector.extract_strided_slice %46 {offsets = [0, 0, 16], sizes = [2, 8, 8], strides = [1, 1, 1]} : vector<2x8x32xf32> to vector<2x8x8xf32>
    %84 = vector.extract_strided_slice %47 {offsets = [0, 0, 16], sizes = [2, 8, 8], strides = [1, 1, 1]} : vector<2x8x32xf32> to vector<2x8x8xf32>
    "tpu.trace_start"() <{level = 10 : i32, message = "bqd,bkd->bqk"}> : () -> ()
    %cst_28 = arith.constant dense<0.000000e+00> : vector<2x8x8xf32>
    %85 = tpu.matmul %82, %83, %cst_28 {dimension_numbers = #tpu.dot_dimension_numbers<[2], [2], [1], [1], [0, 0, 0, 1, 1, 1], [0], [0]>} : vector<2x8x8xf32>, vector<2x8x8xf32>, vector<2x8x8xf32> -> vector<2x8x8xf32>
    "tpu.trace_stop"() : () -> ()
    %86 = vector.broadcast %2 : vector<2x1x8xf32> to vector<2x8x8xf32>
    %87 = arith.addf %85, %86 : vector<2x8x8xf32>
    %cst_29 = arith.constant dense<0xFF800000> : vector<2x8xf32>
    %88 = vector.multi_reduction <maximumf>, %87, %cst_29 [2] : vector<2x8x8xf32> to vector<2x8xf32>
    %89 = vector.shape_cast %88 : vector<2x8xf32> to vector<2x8x1xf32>
    %90 = vector.broadcast %89 : vector<2x8x1xf32> to vector<2x8x8xf32>
    %91 = arith.subf %87, %90 : vector<2x8x8xf32>
    %92 = math.exp %91 : vector<2x8x8xf32>
    %cst_30 = arith.constant dense<0.000000e+00> : vector<2x8xf32>
    %93 = vector.multi_reduction <add>, %92, %cst_30 [2] : vector<2x8x8xf32> to vector<2x8xf32>
    %94 = vector.shape_cast %93 : vector<2x8xf32> to vector<2x8x1xf32>
    %95 = tpu.reciprocal %94 {approx = true} : vector<2x8x1xf32> -> vector<2x8x1xf32>
    %96 = vector.broadcast %95 : vector<2x8x1xf32> to vector<2x8x8xf32>
    %97 = arith.mulf %92, %96 : vector<2x8x8xf32>
    "tpu.trace_start"() <{level = 10 : i32, message = "bqk,bkd->bqd"}> : () -> ()
    %cst_31 = arith.constant dense<0.000000e+00> : vector<2x8x8xf32>
    %98 = tpu.matmul %97, %84, %cst_31 {dimension_numbers = #tpu.dot_dimension_numbers<[2], [1], [1], [2], [0, 0, 0, 1, 1, 2], [0], [0]>} : vector<2x8x8xf32>, vector<2x8x8xf32>, vector<2x8x8xf32> -> vector<2x8x8xf32>
    "tpu.trace_stop"() : () -> ()
    %99 = vector.extract_strided_slice %45 {offsets = [0, 0, 24], sizes = [2, 8, 8], strides = [1, 1, 1]} : vector<2x8x32xf32> to vector<2x8x8xf32>
    %100 = vector.extract_strided_slice %46 {offsets = [0, 0, 24], sizes = [2, 8, 8], strides = [1, 1, 1]} : vector<2x8x32xf32> to vector<2x8x8xf32>
    %101 = vector.extract_strided_slice %47 {offsets = [0, 0, 24], sizes = [2, 8, 8], strides = [1, 1, 1]} : vector<2x8x32xf32> to vector<2x8x8xf32>
    "tpu.trace_start"() <{level = 10 : i32, message = "bqd,bkd->bqk"}> : () -> ()
    %cst_32 = arith.constant dense<0.000000e+00> : vector<2x8x8xf32>
    %102 = tpu.matmul %99, %100, %cst_32 {dimension_numbers = #tpu.dot_dimension_numbers<[2], [2], [1], [1], [0, 0, 0, 1, 1, 1], [0], [0]>} : vector<2x8x8xf32>, vector<2x8x8xf32>, vector<2x8x8xf32> -> vector<2x8x8xf32>
    "tpu.trace_stop"() : () -> ()
    %103 = vector.broadcast %2 : vector<2x1x8xf32> to vector<2x8x8xf32>
    %104 = arith.addf %102, %103 : vector<2x8x8xf32>
    %cst_33 = arith.constant dense<0xFF800000> : vector<2x8xf32>
    %105 = vector.multi_reduction <maximumf>, %104, %cst_33 [2] : vector<2x8x8xf32> to vector<2x8xf32>
    %106 = vector.shape_cast %105 : vector<2x8xf32> to vector<2x8x1xf32>
    %107 = vector.broadcast %106 : vector<2x8x1xf32> to vector<2x8x8xf32>
    %108 = arith.subf %104, %107 : vector<2x8x8xf32>
    %109 = math.exp %108 : vector<2x8x8xf32>
    %cst_34 = arith.constant dense<0.000000e+00> : vector<2x8xf32>
    %110 = vector.multi_reduction <add>, %109, %cst_34 [2] : vector<2x8x8xf32> to vector<2x8xf32>
    %111 = vector.shape_cast %110 : vector<2x8xf32> to vector<2x8x1xf32>
    %112 = tpu.reciprocal %111 {approx = true} : vector<2x8x1xf32> -> vector<2x8x1xf32>
    %113 = vector.broadcast %112 : vector<2x8x1xf32> to vector<2x8x8xf32>
    %114 = arith.mulf %109, %113 : vector<2x8x8xf32>
    "tpu.trace_start"() <{level = 10 : i32, message = "bqk,bkd->bqd"}> : () -> ()
    %cst_35 = arith.constant dense<0.000000e+00> : vector<2x8x8xf32>
    %115 = tpu.matmul %114, %101, %cst_35 {dimension_numbers = #tpu.dot_dimension_numbers<[2], [1], [1], [2], [0, 0, 0, 1, 1, 2], [0], [0]>} : vector<2x8x8xf32>, vector<2x8x8xf32>, vector<2x8x8xf32> -> vector<2x8x8xf32>
    "tpu.trace_stop"() : () -> ()
    %116 = tpu.concatenate %64, %81, %98, %115 in 2 : vector<2x8x8xf32>, vector<2x8x8xf32>, vector<2x8x8xf32>, vector<2x8x8xf32> -> vector<2x8x32xf32>
    %117 = vector.shape_cast %116 : vector<2x8x32xf32> to vector<16x32xf32>
    %118 = arith.truncf %117 : vector<16x32xf32> to vector<16x32xbf16>
    %c0_36 = arith.constant 0 : index
    %c0_37 = arith.constant 0 : index
    %c0_38 = arith.constant 0 : index
    %119 = vector.load %arg5[%c0_36, %c0_37, %c0_38] : memref<2x32x32xbf16, #tpu.memory_space<vmem>>, vector<1x32x32xbf16>
    %120 = vector.shape_cast %119 : vector<1x32x32xbf16> to vector<32x32xbf16>
    %cst_39 = arith.constant dense<0.000000e+00> : vector<16x32xf32>
    %121 = tpu.matmul %118, %120, %cst_39 {dimension_numbers = #tpu.dot_dimension_numbers<[1], [0], [0], [1], [0, 0, 1, 1], [], []>} : vector<16x32xbf16>, vector<32x32xbf16>, vector<16x32xf32> -> vector<16x32xf32>
    %c0_40 = arith.constant 0 : index
    %c0_41 = arith.constant 0 : index
    %122 = vector.load %arg6[%c0_40, %c0_41] : memref<2x32xf32, #tpu.memory_space<vmem>>, vector<1x32xf32>
    %123 = vector.shape_cast %122 : vector<1x32xf32> to vector<32xf32>
    %124 = vector.shape_cast %123 : vector<32xf32> to vector<1x32xf32>
    %125 = vector.broadcast %124 : vector<1x32xf32> to vector<16x32xf32>
    %126 = arith.addf %121, %125 : vector<16x32xf32>
    %127 = arith.addf %1, %126 : vector<16x32xf32>
    %c0_42 = arith.constant 0 : index
    %c0_43 = arith.constant 0 : index
    %128 = vector.load %arg13[%c0_42, %c0_43] : memref<2x32xf32, #tpu.memory_space<vmem>>, vector<1x32xf32>
    %129 = vector.shape_cast %128 : vector<1x32xf32> to vector<32xf32>
    %c0_44 = arith.constant 0 : index
    %c0_45 = arith.constant 0 : index
    %130 = vector.load %arg14[%c0_44, %c0_45] : memref<2x32xf32, #tpu.memory_space<vmem>>, vector<1x32xf32>
    %131 = vector.shape_cast %130 : vector<1x32xf32> to vector<32xf32>
    %cst_46 = arith.constant dense<0.000000e+00> : vector<16xf32>
    %132 = vector.multi_reduction <add>, %127, %cst_46 [1] : vector<16x32xf32> to vector<16xf32>
    %133 = vector.shape_cast %132 : vector<16xf32> to vector<16x1xf32>
    %cst_47 = arith.constant 3.200000e+01 : f32
    %134 = vector.broadcast %cst_47 : f32 to vector<16x1xf32>
    %135 = arith.divf %133, %134 : vector<16x1xf32>
    %136 = vector.broadcast %135 : vector<16x1xf32> to vector<16x32xf32>
    %137 = arith.subf %127, %136 : vector<16x32xf32>
    %138 = arith.mulf %137, %137 : vector<16x32xf32>
    %cst_48 = arith.constant dense<0.000000e+00> : vector<16xf32>
    %139 = vector.multi_reduction <add>, %138, %cst_48 [1] : vector<16x32xf32> to vector<16xf32>
    %140 = vector.shape_cast %139 : vector<16xf32> to vector<16x1xf32>
    %cst_49 = arith.constant 3.200000e+01 : f32
    %141 = vector.broadcast %cst_49 : f32 to vector<16x1xf32>
    %142 = arith.divf %140, %141 : vector<16x1xf32>
    %143 = vector.broadcast %135 : vector<16x1xf32> to vector<16x32xf32>
    %144 = arith.subf %127, %143 : vector<16x32xf32>
    %cst_50 = arith.constant 9.99999974E-6 : f32
    %145 = vector.broadcast %cst_50 : f32 to vector<16x1xf32>
    %146 = arith.addf %142, %145 : vector<16x1xf32>
    %147 = math.rsqrt %146 : vector<16x1xf32>
    %148 = vector.broadcast %147 : vector<16x1xf32> to vector<16x32xf32>
    %149 = arith.mulf %144, %148 : vector<16x32xf32>
    %150 = vector.shape_cast %129 : vector<32xf32> to vector<1x32xf32>
    %151 = vector.broadcast %150 : vector<1x32xf32> to vector<16x32xf32>
    %152 = arith.mulf %149, %151 : vector<16x32xf32>
    %153 = vector.shape_cast %131 : vector<32xf32> to vector<1x32xf32>
    %154 = vector.broadcast %153 : vector<1x32xf32> to vector<16x32xf32>
    %155 = arith.addf %152, %154 : vector<16x32xf32>
    %156 = arith.truncf %155 : vector<16x32xf32> to vector<16x32xbf16>
    %c0_51 = arith.constant 0 : index
    %c0_52 = arith.constant 0 : index
    %c0_53 = arith.constant 0 : index
    %157 = vector.load %arg9[%c0_51, %c0_52, %c0_53] : memref<2x32x64xbf16, #tpu.memory_space<vmem>>, vector<1x32x64xbf16>
    %158 = vector.shape_cast %157 : vector<1x32x64xbf16> to vector<32x64xbf16>
    %cst_54 = arith.constant dense<0.000000e+00> : vector<16x64xf32>
    %159 = tpu.matmul %156, %158, %cst_54 {dimension_numbers = #tpu.dot_dimension_numbers<[1], [0], [0], [1], [0, 0, 1, 1], [], []>} : vector<16x32xbf16>, vector<32x64xbf16>, vector<16x64xf32> -> vector<16x64xf32>
    %c0_55 = arith.constant 0 : index
    %c0_56 = arith.constant 0 : index
    %160 = vector.load %arg10[%c0_55, %c0_56] : memref<2x64xf32, #tpu.memory_space<vmem>>, vector<1x64xf32>
    %161 = vector.shape_cast %160 : vector<1x64xf32> to vector<64xf32>
    %162 = vector.shape_cast %161 : vector<64xf32> to vector<1x64xf32>
    %163 = vector.broadcast %162 : vector<1x64xf32> to vector<16x64xf32>
    %164 = arith.addf %159, %163 : vector<16x64xf32>
    %cst_57 = arith.constant 0.000000e+00 : f32
    %165 = vector.broadcast %cst_57 : f32 to vector<16x64xf32>
    %166 = arith.maximumf %164, %165 : vector<16x64xf32>
    %167 = arith.truncf %166 : vector<16x64xf32> to vector<16x64xbf16>
    %c0_58 = arith.constant 0 : index
    %c0_59 = arith.constant 0 : index
    %c0_60 = arith.constant 0 : index
    %168 = vector.load %arg11[%c0_58, %c0_59, %c0_60] : memref<2x64x32xbf16, #tpu.memory_space<vmem>>, vector<1x64x32xbf16>
    %169 = vector.shape_cast %168 : vector<1x64x32xbf16> to vector<64x32xbf16>
    %cst_61 = arith.constant dense<0.000000e+00> : vector<16x32xf32>
    %170 = tpu.matmul %167, %169, %cst_61 {dimension_numbers = #tpu.dot_dimension_numbers<[1], [0], [0], [1], [0, 0, 1, 1], [], []>} : vector<16x64xbf16>, vector<64x32xbf16>, vector<16x32xf32> -> vector<16x32xf32>
    %c0_62 = arith.constant 0 : index
    %c0_63 = arith.constant 0 : index
    %171 = vector.load %arg12[%c0_62, %c0_63] : memref<2x32xf32, #tpu.memory_space<vmem>>, vector<1x32xf32>
    %172 = vector.shape_cast %171 : vector<1x32xf32> to vector<32xf32>
    %173 = vector.shape_cast %172 : vector<32xf32> to vector<1x32xf32>
    %174 = vector.broadcast %173 : vector<1x32xf32> to vector<16x32xf32>
    %175 = arith.addf %170, %174 : vector<16x32xf32>
    %176 = arith.addf %127, %175 : vector<16x32xf32>
    %c1 = arith.constant 1 : index
    %c0_64 = arith.constant 0 : index
    %177 = vector.load %arg7[%c1, %c0_64] : memref<2x32xf32, #tpu.memory_space<vmem>>, vector<1x32xf32>
    %178 = vector.shape_cast %177 : vector<1x32xf32> to vector<32xf32>
    %c1_65 = arith.constant 1 : index
    %c0_66 = arith.constant 0 : index
    %179 = vector.load %arg8[%c1_65, %c0_66] : memref<2x32xf32, #tpu.memory_space<vmem>>, vector<1x32xf32>
    %180 = vector.shape_cast %179 : vector<1x32xf32> to vector<32xf32>
    %cst_67 = arith.constant dense<0.000000e+00> : vector<16xf32>
    %181 = vector.multi_reduction <add>, %176, %cst_67 [1] : vector<16x32xf32> to vector<16xf32>
    %182 = vector.shape_cast %181 : vector<16xf32> to vector<16x1xf32>
    %cst_68 = arith.constant 3.200000e+01 : f32
    %183 = vector.broadcast %cst_68 : f32 to vector<16x1xf32>
    %184 = arith.divf %182, %183 : vector<16x1xf32>
    %185 = vector.broadcast %184 : vector<16x1xf32> to vector<16x32xf32>
    %186 = arith.subf %176, %185 : vector<16x32xf32>
    %187 = arith.mulf %186, %186 : vector<16x32xf32>
    %cst_69 = arith.constant dense<0.000000e+00> : vector<16xf32>
    %188 = vector.multi_reduction <add>, %187, %cst_69 [1] : vector<16x32xf32> to vector<16xf32>
    %189 = vector.shape_cast %188 : vector<16xf32> to vector<16x1xf32>
    %cst_70 = arith.constant 3.200000e+01 : f32
    %190 = vector.broadcast %cst_70 : f32 to vector<16x1xf32>
    %191 = arith.divf %189, %190 : vector<16x1xf32>
    %192 = vector.broadcast %184 : vector<16x1xf32> to vector<16x32xf32>
    %193 = arith.subf %176, %192 : vector<16x32xf32>
    %cst_71 = arith.constant 9.99999974E-6 : f32
    %194 = vector.broadcast %cst_71 : f32 to vector<16x1xf32>
    %195 = arith.addf %191, %194 : vector<16x1xf32>
    %196 = math.rsqrt %195 : vector<16x1xf32>
    %197 = vector.broadcast %196 : vector<16x1xf32> to vector<16x32xf32>
    %198 = arith.mulf %193, %197 : vector<16x32xf32>
    %199 = vector.shape_cast %178 : vector<32xf32> to vector<1x32xf32>
    %200 = vector.broadcast %199 : vector<1x32xf32> to vector<16x32xf32>
    %201 = arith.mulf %198, %200 : vector<16x32xf32>
    %202 = vector.shape_cast %180 : vector<32xf32> to vector<1x32xf32>
    %203 = vector.broadcast %202 : vector<1x32xf32> to vector<16x32xf32>
    %204 = arith.addf %201, %203 : vector<16x32xf32>
    %205 = arith.truncf %204 : vector<16x32xf32> to vector<16x32xbf16>
    %c1_72 = arith.constant 1 : index
    %c0_73 = arith.constant 0 : index
    %c0_74 = arith.constant 0 : index
    %206 = vector.load %arg3[%c1_72, %c0_73, %c0_74] : memref<2x32x96xbf16, #tpu.memory_space<vmem>>, vector<1x32x96xbf16>
    %207 = vector.shape_cast %206 : vector<1x32x96xbf16> to vector<32x96xbf16>
    %cst_75 = arith.constant dense<0.000000e+00> : vector<16x96xf32>
    %208 = tpu.matmul %205, %207, %cst_75 {dimension_numbers = #tpu.dot_dimension_numbers<[1], [0], [0], [1], [0, 0, 1, 1], [], []>} : vector<16x32xbf16>, vector<32x96xbf16>, vector<16x96xf32> -> vector<16x96xf32>
    %c1_76 = arith.constant 1 : index
    %c0_77 = arith.constant 0 : index
    %209 = vector.load %arg4[%c1_76, %c0_77] : memref<2x96xf32, #tpu.memory_space<vmem>>, vector<1x96xf32>
    %210 = vector.shape_cast %209 : vector<1x96xf32> to vector<96xf32>
    %211 = vector.shape_cast %210 : vector<96xf32> to vector<1x96xf32>
    %212 = vector.broadcast %211 : vector<1x96xf32> to vector<16x96xf32>
    %213 = arith.addf %208, %212 : vector<16x96xf32>
    %214 = vector.extract_strided_slice %213 {offsets = [0, 0], sizes = [16, 32], strides = [1, 1]} : vector<16x96xf32> to vector<16x32xf32>
    %cst_78 = arith.constant 0.353553385 : f32
    %215 = vector.broadcast %cst_78 : f32 to vector<16x32xf32>
    %216 = arith.mulf %214, %215 : vector<16x32xf32>
    %217 = vector.extract_strided_slice %213 {offsets = [0, 32], sizes = [16, 32], strides = [1, 1]} : vector<16x96xf32> to vector<16x32xf32>
    %218 = vector.extract_strided_slice %213 {offsets = [0, 64], sizes = [16, 32], strides = [1, 1]} : vector<16x96xf32> to vector<16x32xf32>
    %219 = vector.shape_cast %216 : vector<16x32xf32> to vector<2x8x32xf32>
    %220 = vector.shape_cast %217 : vector<16x32xf32> to vector<2x8x32xf32>
    %221 = vector.shape_cast %218 : vector<16x32xf32> to vector<2x8x32xf32>
    %222 = vector.extract_strided_slice %219 {offsets = [0, 0, 0], sizes = [2, 8, 8], strides = [1, 1, 1]} : vector<2x8x32xf32> to vector<2x8x8xf32>
    %223 = vector.extract_strided_slice %220 {offsets = [0, 0, 0], sizes = [2, 8, 8], strides = [1, 1, 1]} : vector<2x8x32xf32> to vector<2x8x8xf32>
    %224 = vector.extract_strided_slice %221 {offsets = [0, 0, 0], sizes = [2, 8, 8], strides = [1, 1, 1]} : vector<2x8x32xf32> to vector<2x8x8xf32>
    "tpu.trace_start"() <{level = 10 : i32, message = "bqd,bkd->bqk"}> : () -> ()
    %cst_79 = arith.constant dense<0.000000e+00> : vector<2x8x8xf32>
    %225 = tpu.matmul %222, %223, %cst_79 {dimension_numbers = #tpu.dot_dimension_numbers<[2], [2], [1], [1], [0, 0, 0, 1, 1, 1], [0], [0]>} : vector<2x8x8xf32>, vector<2x8x8xf32>, vector<2x8x8xf32> -> vector<2x8x8xf32>
    "tpu.trace_stop"() : () -> ()
    %226 = vector.broadcast %2 : vector<2x1x8xf32> to vector<2x8x8xf32>
    %227 = arith.addf %225, %226 : vector<2x8x8xf32>
    %cst_80 = arith.constant dense<0xFF800000> : vector<2x8xf32>
    %228 = vector.multi_reduction <maximumf>, %227, %cst_80 [2] : vector<2x8x8xf32> to vector<2x8xf32>
    %229 = vector.shape_cast %228 : vector<2x8xf32> to vector<2x8x1xf32>
    %230 = vector.broadcast %229 : vector<2x8x1xf32> to vector<2x8x8xf32>
    %231 = arith.subf %227, %230 : vector<2x8x8xf32>
    %232 = math.exp %231 : vector<2x8x8xf32>
    %cst_81 = arith.constant dense<0.000000e+00> : vector<2x8xf32>
    %233 = vector.multi_reduction <add>, %232, %cst_81 [2] : vector<2x8x8xf32> to vector<2x8xf32>
    %234 = vector.shape_cast %233 : vector<2x8xf32> to vector<2x8x1xf32>
    %235 = tpu.reciprocal %234 {approx = true} : vector<2x8x1xf32> -> vector<2x8x1xf32>
    %236 = vector.broadcast %235 : vector<2x8x1xf32> to vector<2x8x8xf32>
    %237 = arith.mulf %232, %236 : vector<2x8x8xf32>
    "tpu.trace_start"() <{level = 10 : i32, message = "bqk,bkd->bqd"}> : () -> ()
    %cst_82 = arith.constant dense<0.000000e+00> : vector<2x8x8xf32>
    %238 = tpu.matmul %237, %224, %cst_82 {dimension_numbers = #tpu.dot_dimension_numbers<[2], [1], [1], [2], [0, 0, 0, 1, 1, 2], [0], [0]>} : vector<2x8x8xf32>, vector<2x8x8xf32>, vector<2x8x8xf32> -> vector<2x8x8xf32>
    "tpu.trace_stop"() : () -> ()
    %239 = vector.extract_strided_slice %219 {offsets = [0, 0, 8], sizes = [2, 8, 8], strides = [1, 1, 1]} : vector<2x8x32xf32> to vector<2x8x8xf32>
    %240 = vector.extract_strided_slice %220 {offsets = [0, 0, 8], sizes = [2, 8, 8], strides = [1, 1, 1]} : vector<2x8x32xf32> to vector<2x8x8xf32>
    %241 = vector.extract_strided_slice %221 {offsets = [0, 0, 8], sizes = [2, 8, 8], strides = [1, 1, 1]} : vector<2x8x32xf32> to vector<2x8x8xf32>
    "tpu.trace_start"() <{level = 10 : i32, message = "bqd,bkd->bqk"}> : () -> ()
    %cst_83 = arith.constant dense<0.000000e+00> : vector<2x8x8xf32>
    %242 = tpu.matmul %239, %240, %cst_83 {dimension_numbers = #tpu.dot_dimension_numbers<[2], [2], [1], [1], [0, 0, 0, 1, 1, 1], [0], [0]>} : vector<2x8x8xf32>, vector<2x8x8xf32>, vector<2x8x8xf32> -> vector<2x8x8xf32>
    "tpu.trace_stop"() : () -> ()
    %243 = vector.broadcast %2 : vector<2x1x8xf32> to vector<2x8x8xf32>
    %244 = arith.addf %242, %243 : vector<2x8x8xf32>
    %cst_84 = arith.constant dense<0xFF800000> : vector<2x8xf32>
    %245 = vector.multi_reduction <maximumf>, %244, %cst_84 [2] : vector<2x8x8xf32> to vector<2x8xf32>
    %246 = vector.shape_cast %245 : vector<2x8xf32> to vector<2x8x1xf32>
    %247 = vector.broadcast %246 : vector<2x8x1xf32> to vector<2x8x8xf32>
    %248 = arith.subf %244, %247 : vector<2x8x8xf32>
    %249 = math.exp %248 : vector<2x8x8xf32>
    %cst_85 = arith.constant dense<0.000000e+00> : vector<2x8xf32>
    %250 = vector.multi_reduction <add>, %249, %cst_85 [2] : vector<2x8x8xf32> to vector<2x8xf32>
    %251 = vector.shape_cast %250 : vector<2x8xf32> to vector<2x8x1xf32>
    %252 = tpu.reciprocal %251 {approx = true} : vector<2x8x1xf32> -> vector<2x8x1xf32>
    %253 = vector.broadcast %252 : vector<2x8x1xf32> to vector<2x8x8xf32>
    %254 = arith.mulf %249, %253 : vector<2x8x8xf32>
    "tpu.trace_start"() <{level = 10 : i32, message = "bqk,bkd->bqd"}> : () -> ()
    %cst_86 = arith.constant dense<0.000000e+00> : vector<2x8x8xf32>
    %255 = tpu.matmul %254, %241, %cst_86 {dimension_numbers = #tpu.dot_dimension_numbers<[2], [1], [1], [2], [0, 0, 0, 1, 1, 2], [0], [0]>} : vector<2x8x8xf32>, vector<2x8x8xf32>, vector<2x8x8xf32> -> vector<2x8x8xf32>
    "tpu.trace_stop"() : () -> ()
    %256 = vector.extract_strided_slice %219 {offsets = [0, 0, 16], sizes = [2, 8, 8], strides = [1, 1, 1]} : vector<2x8x32xf32> to vector<2x8x8xf32>
    %257 = vector.extract_strided_slice %220 {offsets = [0, 0, 16], sizes = [2, 8, 8], strides = [1, 1, 1]} : vector<2x8x32xf32> to vector<2x8x8xf32>
    %258 = vector.extract_strided_slice %221 {offsets = [0, 0, 16], sizes = [2, 8, 8], strides = [1, 1, 1]} : vector<2x8x32xf32> to vector<2x8x8xf32>
    "tpu.trace_start"() <{level = 10 : i32, message = "bqd,bkd->bqk"}> : () -> ()
    %cst_87 = arith.constant dense<0.000000e+00> : vector<2x8x8xf32>
    %259 = tpu.matmul %256, %257, %cst_87 {dimension_numbers = #tpu.dot_dimension_numbers<[2], [2], [1], [1], [0, 0, 0, 1, 1, 1], [0], [0]>} : vector<2x8x8xf32>, vector<2x8x8xf32>, vector<2x8x8xf32> -> vector<2x8x8xf32>
    "tpu.trace_stop"() : () -> ()
    %260 = vector.broadcast %2 : vector<2x1x8xf32> to vector<2x8x8xf32>
    %261 = arith.addf %259, %260 : vector<2x8x8xf32>
    %cst_88 = arith.constant dense<0xFF800000> : vector<2x8xf32>
    %262 = vector.multi_reduction <maximumf>, %261, %cst_88 [2] : vector<2x8x8xf32> to vector<2x8xf32>
    %263 = vector.shape_cast %262 : vector<2x8xf32> to vector<2x8x1xf32>
    %264 = vector.broadcast %263 : vector<2x8x1xf32> to vector<2x8x8xf32>
    %265 = arith.subf %261, %264 : vector<2x8x8xf32>
    %266 = math.exp %265 : vector<2x8x8xf32>
    %cst_89 = arith.constant dense<0.000000e+00> : vector<2x8xf32>
    %267 = vector.multi_reduction <add>, %266, %cst_89 [2] : vector<2x8x8xf32> to vector<2x8xf32>
    %268 = vector.shape_cast %267 : vector<2x8xf32> to vector<2x8x1xf32>
    %269 = tpu.reciprocal %268 {approx = true} : vector<2x8x1xf32> -> vector<2x8x1xf32>
    %270 = vector.broadcast %269 : vector<2x8x1xf32> to vector<2x8x8xf32>
    %271 = arith.mulf %266, %270 : vector<2x8x8xf32>
    "tpu.trace_start"() <{level = 10 : i32, message = "bqk,bkd->bqd"}> : () -> ()
    %cst_90 = arith.constant dense<0.000000e+00> : vector<2x8x8xf32>
    %272 = tpu.matmul %271, %258, %cst_90 {dimension_numbers = #tpu.dot_dimension_numbers<[2], [1], [1], [2], [0, 0, 0, 1, 1, 2], [0], [0]>} : vector<2x8x8xf32>, vector<2x8x8xf32>, vector<2x8x8xf32> -> vector<2x8x8xf32>
    "tpu.trace_stop"() : () -> ()
    %273 = vector.extract_strided_slice %219 {offsets = [0, 0, 24], sizes = [2, 8, 8], strides = [1, 1, 1]} : vector<2x8x32xf32> to vector<2x8x8xf32>
    %274 = vector.extract_strided_slice %220 {offsets = [0, 0, 24], sizes = [2, 8, 8], strides = [1, 1, 1]} : vector<2x8x32xf32> to vector<2x8x8xf32>
    %275 = vector.extract_strided_slice %221 {offsets = [0, 0, 24], sizes = [2, 8, 8], strides = [1, 1, 1]} : vector<2x8x32xf32> to vector<2x8x8xf32>
    "tpu.trace_start"() <{level = 10 : i32, message = "bqd,bkd->bqk"}> : () -> ()
    %cst_91 = arith.constant dense<0.000000e+00> : vector<2x8x8xf32>
    %276 = tpu.matmul %273, %274, %cst_91 {dimension_numbers = #tpu.dot_dimension_numbers<[2], [2], [1], [1], [0, 0, 0, 1, 1, 1], [0], [0]>} : vector<2x8x8xf32>, vector<2x8x8xf32>, vector<2x8x8xf32> -> vector<2x8x8xf32>
    "tpu.trace_stop"() : () -> ()
    %277 = vector.broadcast %2 : vector<2x1x8xf32> to vector<2x8x8xf32>
    %278 = arith.addf %276, %277 : vector<2x8x8xf32>
    %cst_92 = arith.constant dense<0xFF800000> : vector<2x8xf32>
    %279 = vector.multi_reduction <maximumf>, %278, %cst_92 [2] : vector<2x8x8xf32> to vector<2x8xf32>
    %280 = vector.shape_cast %279 : vector<2x8xf32> to vector<2x8x1xf32>
    %281 = vector.broadcast %280 : vector<2x8x1xf32> to vector<2x8x8xf32>
    %282 = arith.subf %278, %281 : vector<2x8x8xf32>
    %283 = math.exp %282 : vector<2x8x8xf32>
    %cst_93 = arith.constant dense<0.000000e+00> : vector<2x8xf32>
    %284 = vector.multi_reduction <add>, %283, %cst_93 [2] : vector<2x8x8xf32> to vector<2x8xf32>
    %285 = vector.shape_cast %284 : vector<2x8xf32> to vector<2x8x1xf32>
    %286 = tpu.reciprocal %285 {approx = true} : vector<2x8x1xf32> -> vector<2x8x1xf32>
    %287 = vector.broadcast %286 : vector<2x8x1xf32> to vector<2x8x8xf32>
    %288 = arith.mulf %283, %287 : vector<2x8x8xf32>
    "tpu.trace_start"() <{level = 10 : i32, message = "bqk,bkd->bqd"}> : () -> ()
    %cst_94 = arith.constant dense<0.000000e+00> : vector<2x8x8xf32>
    %289 = tpu.matmul %288, %275, %cst_94 {dimension_numbers = #tpu.dot_dimension_numbers<[2], [1], [1], [2], [0, 0, 0, 1, 1, 2], [0], [0]>} : vector<2x8x8xf32>, vector<2x8x8xf32>, vector<2x8x8xf32> -> vector<2x8x8xf32>
    "tpu.trace_stop"() : () -> ()
    %290 = tpu.concatenate %238, %255, %272, %289 in 2 : vector<2x8x8xf32>, vector<2x8x8xf32>, vector<2x8x8xf32>, vector<2x8x8xf32> -> vector<2x8x32xf32>
    %291 = vector.shape_cast %290 : vector<2x8x32xf32> to vector<16x32xf32>
    %292 = arith.truncf %291 : vector<16x32xf32> to vector<16x32xbf16>
    %c1_95 = arith.constant 1 : index
    %c0_96 = arith.constant 0 : index
    %c0_97 = arith.constant 0 : index
    %293 = vector.load %arg5[%c1_95, %c0_96, %c0_97] : memref<2x32x32xbf16, #tpu.memory_space<vmem>>, vector<1x32x32xbf16>
    %294 = vector.shape_cast %293 : vector<1x32x32xbf16> to vector<32x32xbf16>
    %cst_98 = arith.constant dense<0.000000e+00> : vector<16x32xf32>
    %295 = tpu.matmul %292, %294, %cst_98 {dimension_numbers = #tpu.dot_dimension_numbers<[1], [0], [0], [1], [0, 0, 1, 1], [], []>} : vector<16x32xbf16>, vector<32x32xbf16>, vector<16x32xf32> -> vector<16x32xf32>
    %c1_99 = arith.constant 1 : index
    %c0_100 = arith.constant 0 : index
    %296 = vector.load %arg6[%c1_99, %c0_100] : memref<2x32xf32, #tpu.memory_space<vmem>>, vector<1x32xf32>
    %297 = vector.shape_cast %296 : vector<1x32xf32> to vector<32xf32>
    %298 = vector.shape_cast %297 : vector<32xf32> to vector<1x32xf32>
    %299 = vector.broadcast %298 : vector<1x32xf32> to vector<16x32xf32>
    %300 = arith.addf %295, %299 : vector<16x32xf32>
    %301 = arith.addf %176, %300 : vector<16x32xf32>
    %c1_101 = arith.constant 1 : index
    %c0_102 = arith.constant 0 : index
    %302 = vector.load %arg13[%c1_101, %c0_102] : memref<2x32xf32, #tpu.memory_space<vmem>>, vector<1x32xf32>
    %303 = vector.shape_cast %302 : vector<1x32xf32> to vector<32xf32>
    %c1_103 = arith.constant 1 : index
    %c0_104 = arith.constant 0 : index
    %304 = vector.load %arg14[%c1_103, %c0_104] : memref<2x32xf32, #tpu.memory_space<vmem>>, vector<1x32xf32>
    %305 = vector.shape_cast %304 : vector<1x32xf32> to vector<32xf32>
    %cst_105 = arith.constant dense<0.000000e+00> : vector<16xf32>
    %306 = vector.multi_reduction <add>, %301, %cst_105 [1] : vector<16x32xf32> to vector<16xf32>
    %307 = vector.shape_cast %306 : vector<16xf32> to vector<16x1xf32>
    %cst_106 = arith.constant 3.200000e+01 : f32
    %308 = vector.broadcast %cst_106 : f32 to vector<16x1xf32>
    %309 = arith.divf %307, %308 : vector<16x1xf32>
    %310 = vector.broadcast %309 : vector<16x1xf32> to vector<16x32xf32>
    %311 = arith.subf %301, %310 : vector<16x32xf32>
    %312 = arith.mulf %311, %311 : vector<16x32xf32>
    %cst_107 = arith.constant dense<0.000000e+00> : vector<16xf32>
    %313 = vector.multi_reduction <add>, %312, %cst_107 [1] : vector<16x32xf32> to vector<16xf32>
    %314 = vector.shape_cast %313 : vector<16xf32> to vector<16x1xf32>
    %cst_108 = arith.constant 3.200000e+01 : f32
    %315 = vector.broadcast %cst_108 : f32 to vector<16x1xf32>
    %316 = arith.divf %314, %315 : vector<16x1xf32>
    %317 = vector.broadcast %309 : vector<16x1xf32> to vector<16x32xf32>
    %318 = arith.subf %301, %317 : vector<16x32xf32>
    %cst_109 = arith.constant 9.99999974E-6 : f32
    %319 = vector.broadcast %cst_109 : f32 to vector<16x1xf32>
    %320 = arith.addf %316, %319 : vector<16x1xf32>
    %321 = math.rsqrt %320 : vector<16x1xf32>
    %322 = vector.broadcast %321 : vector<16x1xf32> to vector<16x32xf32>
    %323 = arith.mulf %318, %322 : vector<16x32xf32>
    %324 = vector.shape_cast %303 : vector<32xf32> to vector<1x32xf32>
    %325 = vector.broadcast %324 : vector<1x32xf32> to vector<16x32xf32>
    %326 = arith.mulf %323, %325 : vector<16x32xf32>
    %327 = vector.shape_cast %305 : vector<32xf32> to vector<1x32xf32>
    %328 = vector.broadcast %327 : vector<1x32xf32> to vector<16x32xf32>
    %329 = arith.addf %326, %328 : vector<16x32xf32>
    %330 = arith.truncf %329 : vector<16x32xf32> to vector<16x32xbf16>
    %c1_110 = arith.constant 1 : index
    %c0_111 = arith.constant 0 : index
    %c0_112 = arith.constant 0 : index
    %331 = vector.load %arg9[%c1_110, %c0_111, %c0_112] : memref<2x32x64xbf16, #tpu.memory_space<vmem>>, vector<1x32x64xbf16>
    %332 = vector.shape_cast %331 : vector<1x32x64xbf16> to vector<32x64xbf16>
    %cst_113 = arith.constant dense<0.000000e+00> : vector<16x64xf32>
    %333 = tpu.matmul %330, %332, %cst_113 {dimension_numbers = #tpu.dot_dimension_numbers<[1], [0], [0], [1], [0, 0, 1, 1], [], []>} : vector<16x32xbf16>, vector<32x64xbf16>, vector<16x64xf32> -> vector<16x64xf32>
    %c1_114 = arith.constant 1 : index
    %c0_115 = arith.constant 0 : index
    %334 = vector.load %arg10[%c1_114, %c0_115] : memref<2x64xf32, #tpu.memory_space<vmem>>, vector<1x64xf32>
    %335 = vector.shape_cast %334 : vector<1x64xf32> to vector<64xf32>
    %336 = vector.shape_cast %335 : vector<64xf32> to vector<1x64xf32>
    %337 = vector.broadcast %336 : vector<1x64xf32> to vector<16x64xf32>
    %338 = arith.addf %333, %337 : vector<16x64xf32>
    %cst_116 = arith.constant 0.000000e+00 : f32
    %339 = vector.broadcast %cst_116 : f32 to vector<16x64xf32>
    %340 = arith.maximumf %338, %339 : vector<16x64xf32>
    %341 = arith.truncf %340 : vector<16x64xf32> to vector<16x64xbf16>
    %c1_117 = arith.constant 1 : index
    %c0_118 = arith.constant 0 : index
    %c0_119 = arith.constant 0 : index
    %342 = vector.load %arg11[%c1_117, %c0_118, %c0_119] : memref<2x64x32xbf16, #tpu.memory_space<vmem>>, vector<1x64x32xbf16>
    %343 = vector.shape_cast %342 : vector<1x64x32xbf16> to vector<64x32xbf16>
    %cst_120 = arith.constant dense<0.000000e+00> : vector<16x32xf32>
    %344 = tpu.matmul %341, %343, %cst_120 {dimension_numbers = #tpu.dot_dimension_numbers<[1], [0], [0], [1], [0, 0, 1, 1], [], []>} : vector<16x64xbf16>, vector<64x32xbf16>, vector<16x32xf32> -> vector<16x32xf32>
    %c1_121 = arith.constant 1 : index
    %c0_122 = arith.constant 0 : index
    %345 = vector.load %arg12[%c1_121, %c0_122] : memref<2x32xf32, #tpu.memory_space<vmem>>, vector<1x32xf32>
    %346 = vector.shape_cast %345 : vector<1x32xf32> to vector<32xf32>
    %347 = vector.shape_cast %346 : vector<32xf32> to vector<1x32xf32>
    %348 = vector.broadcast %347 : vector<1x32xf32> to vector<16x32xf32>
    %349 = arith.addf %344, %348 : vector<16x32xf32>
    %350 = arith.addf %301, %349 : vector<16x32xf32>
    %c0_123 = arith.constant 0 : index
    %c0_124 = arith.constant 0 : index
    %351 = vector.load %arg15[%c0_123, %c0_124] : memref<1x32xf32, #tpu.memory_space<vmem>>, vector<1x32xf32>
    %c0_125 = arith.constant 0 : index
    %c0_126 = arith.constant 0 : index
    %352 = vector.load %arg16[%c0_125, %c0_126] : memref<1x32xf32, #tpu.memory_space<vmem>>, vector<1x32xf32>
    %cst_127 = arith.constant dense<0.000000e+00> : vector<16xf32>
    %353 = vector.multi_reduction <add>, %350, %cst_127 [1] : vector<16x32xf32> to vector<16xf32>
    %354 = vector.shape_cast %353 : vector<16xf32> to vector<16x1xf32>
    %cst_128 = arith.constant 3.200000e+01 : f32
    %355 = vector.broadcast %cst_128 : f32 to vector<16x1xf32>
    %356 = arith.divf %354, %355 : vector<16x1xf32>
    %357 = vector.broadcast %356 : vector<16x1xf32> to vector<16x32xf32>
    %358 = arith.subf %350, %357 : vector<16x32xf32>
    %359 = arith.mulf %358, %358 : vector<16x32xf32>
    %cst_129 = arith.constant dense<0.000000e+00> : vector<16xf32>
    %360 = vector.multi_reduction <add>, %359, %cst_129 [1] : vector<16x32xf32> to vector<16xf32>
    %361 = vector.shape_cast %360 : vector<16xf32> to vector<16x1xf32>
    %cst_130 = arith.constant 3.200000e+01 : f32
    %362 = vector.broadcast %cst_130 : f32 to vector<16x1xf32>
    %363 = arith.divf %361, %362 : vector<16x1xf32>
    %364 = vector.broadcast %356 : vector<16x1xf32> to vector<16x32xf32>
    %365 = arith.subf %350, %364 : vector<16x32xf32>
    %cst_131 = arith.constant 9.99999974E-6 : f32
    %366 = vector.broadcast %cst_131 : f32 to vector<16x1xf32>
    %367 = arith.addf %363, %366 : vector<16x1xf32>
    %368 = math.rsqrt %367 : vector<16x1xf32>
    %369 = vector.broadcast %368 : vector<16x1xf32> to vector<16x32xf32>
    %370 = arith.mulf %365, %369 : vector<16x32xf32>
    %371 = vector.broadcast %351 : vector<1x32xf32> to vector<16x32xf32>
    %372 = arith.mulf %370, %371 : vector<16x32xf32>
    %373 = vector.broadcast %352 : vector<1x32xf32> to vector<16x32xf32>
    %374 = arith.addf %372, %373 : vector<16x32xf32>
    %375 = vector.shape_cast %374 : vector<16x32xf32> to vector<2x8x32xf32>
    %376 = vector.extract_strided_slice %375 {offsets = [0, 0, 0], sizes = [1, 8, 32], strides = [1, 1, 1]} : vector<2x8x32xf32> to vector<1x8x32xf32>
    %377 = vector.shape_cast %376 : vector<1x8x32xf32> to vector<8x32xf32>
    %c0_132 = arith.constant 0 : index
    %c0_133 = arith.constant 0 : index
    %c0_134 = arith.constant 0 : index
    %378 = vector.load %arg17[%c0_132, %c0_133, %c0_134] : memref<8x2x32xf32, #tpu.memory_space<vmem>>, vector<8x1x32xf32>
    %379 = vector.shape_cast %378 : vector<8x1x32xf32> to vector<8x32xf32>
    %380 = vector.shape_cast %377 : vector<8x32xf32> to vector<8x1x32xf32>
    tpu.vector_store %arg17[%c0_132, %c0_133, %c0_134], %380 {strides = array<i32>} : memref<8x2x32xf32, #tpu.memory_space<vmem>>, vector<8x1x32xf32>,
    %381 = vector.extract_strided_slice %375 {offsets = [1, 0, 0], sizes = [1, 8, 32], strides = [1, 1, 1]} : vector<2x8x32xf32> to vector<1x8x32xf32>
    %382 = vector.shape_cast %381 : vector<1x8x32xf32> to vector<8x32xf32>
    %c0_135 = arith.constant 0 : index
    %c1_136 = arith.constant 1 : index
    %c0_137 = arith.constant 0 : index
    %383 = vector.load %arg17[%c0_135, %c1_136, %c0_137] : memref<8x2x32xf32, #tpu.memory_space<vmem>>, vector<8x1x32xf32>
    %384 = vector.shape_cast %383 : vector<8x1x32xf32> to vector<8x32xf32>
    %385 = vector.shape_cast %382 : vector<8x32xf32> to vector<8x1x32xf32>
    tpu.vector_store %arg17[%c0_135, %c1_136, %c0_137], %385 {strides = array<i32>} : memref<8x2x32xf32, #tpu.memory_space<vmem>>, vector<8x1x32xf32>,
    return
  }
  func.func @transform_0(%arg0: i32) -> (i32, i32, i32) {
    %c0_i32 = arith.constant 0 : i32
    %c0_i32_0 = arith.constant 0 : i32
    %c0_i32_1 = arith.constant 0 : i32
    return %arg0, %c0_i32, %c0_i32_0 : i32, i32, i32
  }
  func.func @transform_1(%arg0: i32) -> (i32, i32, i32) {
    %c0_i32 = arith.constant 0 : i32
    %c0_i32_0 = arith.constant 0 : i32
    %c0_i32_1 = arith.constant 0 : i32
    return %arg0, %c0_i32, %c0_i32_0 : i32, i32, i32
  }
  func.func @transform_2(%arg0: i32) -> (i32, i32, i32) {
    %c0_i32 = arith.constant 0 : i32
    %c0_i32_0 = arith.constant 0 : i32
    %c0_i32_1 = arith.constant 0 : i32
    %c0_i32_2 = arith.constant 0 : i32
    return %c0_i32, %c0_i32_0, %c0_i32_1 : i32, i32, i32
  }
  func.func @transform_3(%arg0: i32) -> (i32, i32) {
    %c0_i32 = arith.constant 0 : i32
    %c0_i32_0 = arith.constant 0 : i32
    %c0_i32_1 = arith.constant 0 : i32
    return %c0_i32, %c0_i32_0 : i32, i32
  }
  func.func @transform_4(%arg0: i32) -> (i32, i32, i32) {
    %c0_i32 = arith.constant 0 : i32
    %c0_i32_0 = arith.constant 0 : i32
    %c0_i32_1 = arith.constant 0 : i32
    %c0_i32_2 = arith.constant 0 : i32
    return %c0_i32, %c0_i32_0, %c0_i32_1 : i32, i32, i32
  }
  func.func @transform_5(%arg0: i32) -> (i32, i32) {
    %c0_i32 = arith.constant 0 : i32
    %c0_i32_0 = arith.constant 0 : i32
    %c0_i32_1 = arith.constant 0 : i32
    return %c0_i32, %c0_i32_0 : i32, i32
  }
  func.func @transform_6(%arg0: i32) -> (i32, i32) {
    %c0_i32 = arith.constant 0 : i32
    %c0_i32_0 = arith.constant 0 : i32
    %c0_i32_1 = arith.constant 0 : i32
    return %c0_i32, %c0_i32_0 : i32, i32
  }
  func.func @transform_7(%arg0: i32) -> (i32, i32) {
    %c0_i32 = arith.constant 0 : i32
    %c0_i32_0 = arith.constant 0 : i32
    %c0_i32_1 = arith.constant 0 : i32
    return %c0_i32, %c0_i32_0 : i32, i32
  }
  func.func @transform_8(%arg0: i32) -> (i32, i32, i32) {
    %c0_i32 = arith.constant 0 : i32
    %c0_i32_0 = arith.constant 0 : i32
    %c0_i32_1 = arith.constant 0 : i32
    %c0_i32_2 = arith.constant 0 : i32
    return %c0_i32, %c0_i32_0, %c0_i32_1 : i32, i32, i32
  }
  func.func @transform_9(%arg0: i32) -> (i32, i32) {
    %c0_i32 = arith.constant 0 : i32
    %c0_i32_0 = arith.constant 0 : i32
    %c0_i32_1 = arith.constant 0 : i32
    return %c0_i32, %c0_i32_0 : i32, i32
  }
  func.func @transform_10(%arg0: i32) -> (i32, i32, i32) {
    %c0_i32 = arith.constant 0 : i32
    %c0_i32_0 = arith.constant 0 : i32
    %c0_i32_1 = arith.constant 0 : i32
    %c0_i32_2 = arith.constant 0 : i32
    return %c0_i32, %c0_i32_0, %c0_i32_1 : i32, i32, i32
  }
  func.func @transform_11(%arg0: i32) -> (i32, i32) {
    %c0_i32 = arith.constant 0 : i32
    %c0_i32_0 = arith.constant 0 : i32
    %c0_i32_1 = arith.constant 0 : i32
    return %c0_i32, %c0_i32_0 : i32, i32
  }
  func.func @transform_12(%arg0: i32) -> (i32, i32) {
    %c0_i32 = arith.constant 0 : i32
    %c0_i32_0 = arith.constant 0 : i32
    %c0_i32_1 = arith.constant 0 : i32
    return %c0_i32, %c0_i32_0 : i32, i32
  }
  func.func @transform_13(%arg0: i32) -> (i32, i32) {
    %c0_i32 = arith.constant 0 : i32
    %c0_i32_0 = arith.constant 0 : i32
    %c0_i32_1 = arith.constant 0 : i32
    return %c0_i32, %c0_i32_0 : i32, i32
  }
  func.func @transform_14(%arg0: i32) -> (i32, i32) {
    %c0_i32 = arith.constant 0 : i32
    %c0_i32_0 = arith.constant 0 : i32
    %c0_i32_1 = arith.constant 0 : i32
    return %c0_i32, %c0_i32_0 : i32, i32
  }
  func.func @transform_15(%arg0: i32) -> (i32, i32) {
    %c0_i32 = arith.constant 0 : i32
    %c0_i32_0 = arith.constant 0 : i32
    %c0_i32_1 = arith.constant 0 : i32
    return %c0_i32, %c0_i32_0 : i32, i32
  }
  func.func @transform_16(%arg0: i32) -> (i32, i32, i32) {
    %c0_i32 = arith.constant 0 : i32
    %c0_i32_0 = arith.constant 0 : i32
    %c0_i32_1 = arith.constant 0 : i32
    return %c0_i32, %arg0, %c0_i32_0 : i32, i32, i32
  }
}

</mosaic_0001>

<bundles_post_ra>
// kernel: tpu_custom_call.1
= control target key start
LH: loop header
LB: loop body
LE: loop exit
PB: predicated region body
PF: predicated region fallthrough
CT: control target
= control target key end

     0   :  { %s5281_s0 = inlined_call_operand.hbm [shape: f32[2,8,32], index: 0, kind: input, shape index: {}]   ;;  %s5282_s1 = inlined_call_operand.vmem [shape: f32[2,1,8], index: 1, kind: input, shape index: {}]   ;;  %s5283_s2 = inlined_call_operand.vmem [shape: bf16[2,32,96], index: 2, kind: input, shape index: {}]   ;;  %s5284_s3 = inlined_call_operand.vmem [shape: f32[2,96], index: 3, kind: input, shape index: {}]   ;;  %s5285_s4 = inlined_call_operand.vmem [shape: bf16[2,32,32], index: 4, kind: input, shape index: {}]   ;;  %s5286_s5 = inlined_call_operand.hbm [shape: f32[2,32], index: 5, kind: input, shape index: {}]   ;;  %s5287_s6 = inlined_call_operand.hbm [shape: f32[2,32], index: 6, kind: input, shape index: {}]   ;;  %s5288_s7 = inlined_call_operand.hbm [shape: f32[2,32], index: 7, kind: input, shape index: {}]   ;;  %s5289_s8 = inlined_call_operand.vmem [shape: bf16[2,32,64], index: 8, kind: input, shape index: {}]   ;;  %s5290_s9 = inlined_call_operand.hbm [shape: f32[2,64], index: 9, kind: input, shape index: {}]   ;;  %s5291_s10 = inlined_call_operand.vmem [shape: bf16[2,64,32], index: 10, kind: input, shape index: {}]   ;;  %s5292_s11 = inlined_call_operand.vmem [shape: f32[2,32], index: 11, kind: input, shape index: {}]   ;;  %s5293_s12 = inlined_call_operand.vmem [shape: f32[2,32], index: 12, kind: input, shape index: {}]   ;;  %s5294_s13 = inlined_call_operand.vmem [shape: f32[2,32], index: 13, kind: input, shape index: {}]   ;;  %s5295_s14 = inlined_call_operand.vmem [shape: f32[1,32], index: 14, kind: input, shape index: {}]   ;;  %s5296_s15 = inlined_call_operand.vmem [shape: f32[1,32], index: 15, kind: input, shape index: {}]   ;;  %s5297_s16 = inlined_call_operand.hbm [shape: f32[8,2,32], index: 16, kind: output, shape index: {}]  }
   0x1   :  { %5302 = sst [smem:[#allocation16_spill]] %s5281_s0 }
   0x2   :  { %21 = vsyncpa [#allocation3], 0 }
   0x3   :  { %22 = vsyncpa [#allocation6], 0 }
   0x4   :  { %23 = vsyncpa [#allocation9], 0 }
   0x5   :  { %24 = vsyncpa [#allocation4], 0  ;;  %s4515_s21 = smov [#allocation5]   ;;  %s4516_s23 = smov [#allocation8]  }
   0x6   :  { %s51_s22 = sshll.u32 %s4515_s21, 4  ;;  %s71_s24 = sshll.u32 %s4516_s23, 4  ;;  %s52_s22 = int_to_ptr.vmem [resolvable:$true] %s51_s22  ;;  %s72_s24 = int_to_ptr.vmem [resolvable:$true] %s71_s24 }
   0x7   :  { %s4375_s27 = scalar_lea.hbm %s5286_s5, 32 }
   0x8   :  { %p4376_p0 = scmp.ne.s32.totalorder %s5286_s5, %s4375_s27  ;;  %p4379_p1 = scmp.lt.u32.totalorder %s4375_s27, %s5286_s5 }
   0xa   :  { %p4381_p2 = pnand %p4379_p1, %p4376_p0 }
   0xc   :  { %4384 = shalt.err (!%p4381_p2)
}
   0xd   :  { %s4385_s17 = scalar_lea.vmem %s52_s22, 32  ;;  %p4390_p4 = scmp.lt.s32.totalorder %s52_s22, %s52_s22 }
   0xe   :  { %p4386_p3 = scmp.ne.s32.totalorder %s52_s22, %s4385_s17  ;;  %p4391_p5 = scmp.lt.s32.totalorder %s4385_s17, %s4385_s17 }
  0x10   :  { %p4392_p6 = por %p4391_p5, %p4390_p4 }
  0x12   :  { %p4393_p7 = pnand %p4392_p6, %p4386_p3 }
  0x14   :  { %4396 = shalt.err (!%p4393_p7)
}
  0x15   :  { %54 = dma.hbm_to_vmem [thread:$0]  %s5286_s5, 32, %s52_s22, [#allocation6]  }
  0x16   :  { %s4397_s23 = scalar_lea.hbm %s5288_s7, 32 }
  0x17   :  { %p4398_p8 = scmp.ne.s32.totalorder %s5288_s7, %s4397_s23  ;;  %p4401_p9 = scmp.lt.u32.totalorder %s4397_s23, %s5288_s7 }
  0x19   :  { %p4403_p10 = pnand %p4401_p9, %p4398_p8 }
  0x1b   :  { %4406 = shalt.err (!%p4403_p10)
}
  0x1c   :  { %s4407_s29 = scalar_lea.vmem %s72_s24, 32  ;;  %p4412_p12 = scmp.lt.s32.totalorder %s72_s24, %s72_s24 }
  0x1d   :  { %p4408_p11 = scmp.ne.s32.totalorder %s72_s24, %s4407_s29  ;;  %p4413_p13 = scmp.lt.s32.totalorder %s4407_s29, %s4407_s29 }
  0x1f   :  { %p4414_p0 = por %p4413_p13, %p4412_p12 }
  0x21   :  { %p4415_p1 = pnand %p4414_p0, %p4408_p11 }
  0x23   :  { %4418 = shalt.err (!%p4415_p1)
}
  0x24   :  { %74 = dma.hbm_to_vmem [thread:$0]  %s5288_s7, 32, %s72_s24, [#allocation9]  }
  0x25   :  { %s4517_s30 = smov [#allocation2]   ;;  %s5303_s19 = sld [smem:[#allocation16_spill]] }
  0x26   :  { %s30_s0 = sshll.u32 %s4517_s30, 4  ;;  %s31_s0 = int_to_ptr.vmem [resolvable:$true] %s30_s0 }
  0x2b   :  { %s4419_s20 = scalar_lea.hbm %s5303_s19, 256 }
  0x2c   :  { %p4420_p2 = scmp.ne.s32.totalorder %s5303_s19, %s4419_s20  ;;  %p4423_p3 = scmp.lt.u32.totalorder %s4419_s20, %s5303_s19 }
  0x2e   :  { %p4425_p4 = pnand %p4423_p3, %p4420_p2 }
  0x30   :  { %4428 = shalt.err (!%p4425_p4)
}
  0x31   :  { %s4429_s27 = scalar_lea.vmem %s31_s0, 256  ;;  %p4434_p6 = scmp.lt.s32.totalorder %s31_s0, %s31_s0 }
  0x32   :  { %p4430_p5 = scmp.ne.s32.totalorder %s31_s0, %s4429_s27  ;;  %p4435_p7 = scmp.lt.s32.totalorder %s4429_s27, %s4429_s27 }
  0x34   :  { %p4436_p8 = por %p4435_p7, %p4434_p6 }
  0x36   :  { %p4437_p9 = pnand %p4436_p8, %p4430_p5 }
  0x38   :  { %4440 = shalt.err (!%p4437_p9)
}
  0x39   :  { %s4518_s7 = smov 128   ;;  %s5301_s24 = smov 8  }
  0x3a   :  { %36 = dma.hbm_to_vmem [thread:$0]  %s5303_s19, 256, %s31_s0, [#allocation3], %s4518_s7, %s4518_s7, %s5301_s24  }
  0x3b   :  { %s4520_s5 = smov [#allocation7]   ;;  %s4521_s30 = smov [#allocation10]  }
  0x3c   :  { %s61_s22 = sshll.u32 %s4520_s5, 4  ;;  %s83_s17 = sshll.u32 %s4521_s30, 4  ;;  %s62_s22 = int_to_ptr.vmem [resolvable:$true] %s61_s22  ;;  %s84_s17 = int_to_ptr.vmem [resolvable:$true] %s83_s17 }
  0x3d   :  { %s4441_s21 = scalar_lea.hbm %s5287_s6, 32 }
  0x3e   :  { %p4442_p10 = scmp.ne.s32.totalorder %s5287_s6, %s4441_s21  ;;  %p4445_p11 = scmp.lt.u32.totalorder %s4441_s21, %s5287_s6 }
  0x40   :  { %p4447_p12 = pnand %p4445_p11, %p4442_p10 }
  0x42   :  { %4450 = shalt.err (!%p4447_p12)
}
  0x43   :  { %s4451_s0 = scalar_lea.vmem %s62_s22, 32  ;;  %p4456_p0 = scmp.lt.s32.totalorder %s62_s22, %s62_s22 }
  0x44   :  { %p4452_p13 = scmp.ne.s32.totalorder %s62_s22, %s4451_s0  ;;  %p4457_p1 = scmp.lt.s32.totalorder %s4451_s0, %s4451_s0 }
  0x46   :  { %p4458_p2 = por %p4457_p1, %p4456_p0 }
  0x48   :  { %p4459_p3 = pnand %p4458_p2, %p4452_p13 }
  0x4a   :  { %4462 = shalt.err (!%p4459_p3)
}
  0x4b   :  { %64 = dma.hbm_to_vmem [thread:$0]  %s5287_s6, 32, %s62_s22, [#allocation6]  }
  0x4c   :  { %s4463_s5 = scalar_lea.hbm %s5290_s9, 32 }
  0x4d   :  { %p4464_p4 = scmp.ne.s32.totalorder %s5290_s9, %s4463_s5  ;;  %p4467_p5 = scmp.lt.u32.totalorder %s4463_s5, %s5290_s9 }
  0x4f   :  { %p4469_p6 = pnand %p4467_p5, %p4464_p4 }
  0x51   :  { %4472 = shalt.err (!%p4469_p6)
}
  0x52   :  { %s4473_s23 = scalar_lea.vmem %s84_s17, 32  ;;  %p4478_p8 = scmp.lt.s32.totalorder %s84_s17, %s84_s17 }
  0x53   :  { %p4474_p7 = scmp.ne.s32.totalorder %s84_s17, %s4473_s23  ;;  %p4479_p9 = scmp.lt.s32.totalorder %s4473_s23, %s4473_s23 }
  0x55   :  { %p4480_p10 = por %p4479_p9, %p4478_p8 }
  0x57   :  { %p4481_p11 = pnand %p4480_p10, %p4474_p7 }
  0x59   :  { %4484 = shalt.err (!%p4481_p11)
}
  0x5a   :  { %86 = dma.hbm_to_vmem [thread:$0]  %s5290_s9, 32, %s84_s17, [#allocation9]  }
  0x5b   :  { %4507 = dma.done.wait [#allocation3], 256  }
  0x5c   :  { %4508 = vsyncadd [#allocation3], 4294967040 }
  0x5d   :  { %4509 = dma.done.wait [#allocation6], 64  }
  0x5e   :  { %4510 = vsyncadd [#allocation6], 4294967232 }
  0x5f   :  { %4511 = dma.done.wait [#allocation9], 64  }
  0x60   :  { %4512 = vsyncadd [#allocation9], 4294967232  ;;  %vm121_vm0 = vcmask 261120   ;;  %v4687_v0 = vld [vmem:[#allocation2] sm:$0xff]  ;;  %v4689_v1 = vld [vmem:[#allocation2 + $0x8] sm:$0xff]  ;;  %v4522_v15 = vmov 0.0  }
  0x61   :  { %v122_v2 = vsel %vm121_vm0, %v4687_v0, 0.0  ;;  %v125_v3 = vsel %vm121_vm0, %v4689_v1, 0.0  ;;  %v4269_v14 = vld [vmem:[%s5283_s2] sm:$0xff]   ;;  %3981 = vmatprep.subr.bf16.mxu0 %v4522_v15  ;;  %vm4523_vm1 = vmmov 0   ;;  %v4270_v16 = vld [vmem:[%s5283_s2 + $0x8] sm:$0xff]   ;;  %3994 = vmatprep.subr.mxu1 %v4522_v15  ;;  %s4524_s19 = smov 96  }
  0x62   :  { %123 = vadd.xlane.f32.xlu0 %v122_v2  ;;  %3985 = vmatprep.mubr.msk.bf16.mxu0 %vm4523_vm1, %v4522_v15  ;;  %v3773_v25 = vld [vmem:[#allocation7] ss:$0 sm:$0xff]  ;;  %v3774_v29 = vld [vmem:[#allocation8] ss:$0 sm:$0xff]  ;;  %v3775_v34 = vld [vmem:[%s5284_s3] ss:$0 sm:$0xff] }
  0x63   :  { %3982 = vmatpush3.bf16.msra.mxu0 %v4269_v14  ;;  %3996 = vmatprep.mubr.msk.f32.mxu1 %vm4523_vm1, %v4522_v15  ;;  %vm244_vm2 = vcmask 64512   ;;  %v4748_v45 = vld [vmem:[%s5282_s1] ss:$0 sm:$0xff]  ;;  %v4753_v47 = vld [vmem:[%s5282_s1 + $0x1] ss:$0 sm:$0xff]  ;;  %s4525_s30 = smov 64  }
  0x64   :  { %3983 = vmatprep.subr.bf16.mxu0 %v4522_v15  ;;  %s4526_s18 = smov 88   ;;  %s4527_s20 = smov 120   ;;  %vm1588_vm3 = vcmask 130048   ;;  %vm1591_vm4 = vcmask 195584   ;;  %vm1808_vm5 = vcmask 523264   ;;  %vm3679_vm6 = vcmask 253952  }
  0x65   :  { %s4528_s21 = smov 56   ;;  %s4529_s23 = smov 80  }
  0x66   :  { %126 = vadd.xlane.f32.xlu0 %v125_v3  ;;  %s4530_s6 = smov 112   ;;  %s4531_s22 = smov 48  }
  0x67   :  { %3984 = vmatpush3.bf16.msra.mxu0 %v4270_v16  ;;  %s4532_s9 = smov 72   ;;  %s4533_s17 = smov 104  }
  0x68   :  { %3989 = vmatprep.subr.mxu0 %v4522_v15  ;;  %s4534_s25 = smov 40   ;;  %s5300_s26 = smov 16  }
  0x69   :  { %s5299_s29 = smov 24  }
  0xef   :  { %v124_v4 = vpop.xlane.xlu0 %123 }
  0xf0   :  { %v129_v5 = vmul.f32 0.03125, %v124_v4 }
  0xf2   :  { %v131_v6 = vsub.f32 %v4687_v0, %v129_v5 }
  0xf3   :  { %v127_v7 = vpop.xlane.xlu0 %126 }
  0xf4   :  { %v130_v8 = vmul.f32 0.03125, %v127_v7  ;;  %v133_v9 = vmul.f32 %v131_v6, %v131_v6 }
  0xf6   :  { %v132_v10 = vsub.f32 %v4689_v1, %v130_v8  ;;  %v135_v11 = vsel %vm121_vm0, %v133_v9, 0.0 }
  0xf7   :  { %136 = vadd.xlane.f32.xlu1 %v135_v11 }
  0xf8   :  { %v134_v12 = vmul.f32 %v132_v10, %v132_v10 }
  0xfa   :  { %v138_v13 = vsel %vm121_vm0, %v134_v12, 0.0 }
  0xfb   :  { %139 = vadd.xlane.f32.xlu1 %v138_v13 }
 0x184   :  { %v137_v17 = vpop.xlane.xlu1 %136 }
 0x185   :  { %v141_v18 = vmul.f32 0.03125, %v137_v17 }
 0x187   :  { %v143_v19 = vadd.f32 1e-05, %v141_v18 }
 0x188   :  { %v140_v20 = vpop.xlane.xlu1 %139 }
 0x189   :  { %4289 = vrsqrt.f32 %v143_v19  ;;  %v142_v21 = vmul.f32 0.03125, %v140_v20 }
 0x18b   :  { %v144_v22 = vadd.f32 1e-05, %v142_v21 }
 0x18d   :  { %4291 = vrsqrt.f32 %v144_v22 }
 0x193   :  { %v4290_v23 = vpop.eup %4289 }
 0x194   :  { %v147_v24 = vmul.f32 %v4290_v23, %v131_v6 }
 0x196   :  { %v153_v28 = vmul.f32 %v3773_v25, %v147_v24 }
 0x197   :  { %v4292_v26 = vpop.eup %4291 }
 0x198   :  { %v148_v27 = vmul.f32 %v4292_v26, %v132_v10  ;;  %v159_v31 = vadd.f32 %v3774_v29, %v153_v28 }
 0x19a   :  { %v154_v30 = vmul.f32 %v3773_v25, %v148_v27 }
 0x19c   :  { %v160_v32 = vadd.f32 %v3774_v29, %v154_v30 }
 0x19e   :  { %v161_v33 = vpack.c.bf16 %v160_v32, %v159_v31 }
 0x1a0   :  { %3986 = vmatmul.mubr.msk.bf16.vlgmr.msra.gmra.mrb[0].mxu0 %vm121_vm0, %v161_v33 }
 0x1a1   :  { %3991 = vmatprep.mubr.msk.f32.mxu0 %vm4523_vm1, %v4522_v15 }
 0x273   :  { %v220_v35 = vpop.f32.mrb[0].mxu0 }
 0x274   :  { %v4719_v36 = vadd.f32 %v3775_v34, %v220_v35  ;;  %v3987_v37 = vpop.f32.mrb[1].mxu0 }
 0x275   :  { %v223_v38 = vpop.f32.mrb[2].mxu0 }
 0x276   :  { %v4721_v39 = vadd.f32 %v3775_v34, %v223_v38  ;;  %242 = vrot.lane.b32.xlu0 %v4719_v36, %s4524_s19  ;;  %v3988_v40 = vpop.f32.mrb[3].mxu0  ;;  %v4729_v43 = vmul.f32 0.35355338, %v4719_v36 }
 0x278   :  { %321 = vrot.lane.b32.xlu1 %v4721_v39, %s4524_s19  ;;  %v4736_v44 = vmul.f32 0.35355338, %v4721_v39 }
 0x2e8   :  { %v243_v41 = vpop.permute.xlu0 %242 }
 0x2e9   :  { %3990 = vmatpush3.xpose.msk.msra.mxu0 %vm244_vm2, %v243_v41 }
 0x2ea   :  { %v322_v42 = vpop.permute.xlu1 %321  ;;  %4004 = vmatprep.subr.mxu0 %v4522_v15 }
 0x2eb   :  { %3995 = vmatpush3.xpose.msk.msra.mxu1 %vm244_vm2, %v322_v42 }
 0x2ec   :  { %3992 = vmatmul.mubr.msk.f32.vlgmr.msra.gmra.mrb[4].mxu0 %vm244_vm2, %v4729_v43  ;;  %3999 = vmatprep.subr.mxu1 %v4522_v15 }
 0x2ed   :  { %4006 = vmatprep.mubr.msk.f32.mxu0 %vm4523_vm1, %v4522_v15 }
 0x2ee   :  { %3997 = vmatmul.mubr.msk.f32.vlgmr.msra.gmra.mrb[0].mxu1 %vm244_vm2, %v4736_v44 }
 0x2ef   :  { %4001 = vmatprep.mubr.msk.f32.mxu1 %vm4523_vm1, %v4522_v15 }
 0x3bf   :  { %v316_v46 = vpop.f32.mrb[4].mxu0 }
 0x3c0   :  { %v317_v48 = vadd.f32 %v4748_v45, %v316_v46  ;;  %v3993_v49 = vpop.f32.mrb[5].mxu0 }
 0x3c1   :  { %v394_v50 = vpop.f32.mrb[0].mxu1 }
 0x3c2   :  { %v395_v51 = vadd.f32 %v4753_v47, %v394_v50  ;;  %v3998_v52 = vpop.f32.mrb[1].mxu1  ;;  %v398_v53 = vsel %vm244_vm2, %v317_v48, -inf }
 0x3c3   :  { %399 = vmax.xlane.f32.xlu1 %v398_v53 }
 0x3c4   :  { %v401_v54 = vsel %vm244_vm2, %v395_v51, -inf }
 0x3c5   :  { %402 = vmax.xlane.f32.xlu0 %v401_v54 }
 0x3d4   :  { %496 = vrot.lane.b32.xlu1 %v4721_v39, %s4525_s30 }
 0x3d8   :  { %574 = vrot.lane.b32.xlu1 %v4719_v36, %s4526_s18 }
 0x3db   :  { %420 = vrot.lane.b32.xlu0 %v4719_v36, %s4525_s30 }
 0x3dc   :  { %652 = vrot.lane.b32.xlu1 %v4721_v39, %s4526_s18 }
 0x450   :  { %v400_v55 = vpop.xlane.xlu1 %399 }
 0x451   :  { %v404_v56 = vsub.f32 %v317_v48, %v400_v55 }
 0x452   :  { %v403_v57 = vpop.xlane.xlu0 %402 }
 0x453   :  { %v406_v58 = vmul.f32 1.442695, %v404_v56  ;;  %v405_v59 = vsub.f32 %v395_v51, %v403_v57 }
 0x454   :  { %v497_v60 = vpop.permute.xlu1 %496 }
 0x455   :  { %4293 = vpow2.f32 %v406_v58  ;;  %v408_v61 = vmul.f32 1.442695, %v405_v59  ;;  %4005 = vmatpush3.msra.mxu0 %v497_v60 }
 0x456   :  { %v421_v62 = vpop.permute.xlu0 %420  ;;  %4014 = vmatprep.subr.mxu0 %v4522_v15 }
 0x457   :  { %4295 = vpow2.f32 %v408_v61  ;;  %4000 = vmatpush3.msra.mxu1 %v421_v62 }
 0x458   :  { %4009 = vmatprep.subr.mxu1 %v4522_v15  ;;  %v575_v5 = vpop.permute.xlu1 %574 }
 0x45c   :  { %v653_v6 = vpop.permute.xlu1 %652 }
 0x45f   :  { %v4294_v63 = vpop.eup %4293 }
 0x460   :  { %v410_v2 = vsel %vm244_vm2, %v4294_v63, 0.0 }
 0x461   :  { %v4296_v3 = vpop.eup %4295  ;;  %411 = vadd.xlane.f32.xlu0 %v410_v2 }
 0x462   :  { %v413_v4 = vsel %vm244_vm2, %v4296_v3, 0.0 }
 0x463   :  { %414 = vadd.xlane.f32.xlu1 %v413_v4 }
 0x474   :  { %650 = vrot.lane.b32.xlu1 %v4736_v44, %s4527_s20 }
 0x477   :  { %572 = vrot.lane.b32.xlu0 %v4729_v43, %s4527_s20 }
 0x4ee   :  { %v412_v7 = vpop.xlane.xlu0 %411 }
 0x4ef   :  { %4297 = vrcp.f32 %v412_v7 }
 0x4f0   :  { %v415_v8 = vpop.xlane.xlu1 %414 }
 0x4f1   :  { %4299 = vrcp.f32 %v415_v8 }
 0x4f2   :  { %v573_v13 = vpop.permute.xlu0 %572 }
 0x4f4   :  { %v651_v14 = vpop.permute.xlu1 %650 }
 0x4f9   :  { %v4298_v9 = vpop.eup %4297 }
 0x4fa   :  { %v418_v10 = vmul.f32 %v4298_v9, %v4294_v63 }
 0x4fb   :  { %v4300_v11 = vpop.eup %4299 }
 0x4fc   :  { %v419_v12 = vmul.f32 %v4300_v11, %v4296_v3  ;;  %4002 = vmatmul.mubr.msk.f32.vlgmr.msra.gmra.mrb[2].mxu1 %vm244_vm2, %v418_v10 }
 0x4fd   :  { %4010 = vmatpush3.xpose.msk.msra.mxu1 %vm244_vm2, %v575_v5  ;;  %4011 = vmatprep.mubr.msk.f32.mxu1 %vm4523_vm1, %v4522_v15 }
 0x4fe   :  { %4007 = vmatmul.mubr.msk.f32.vlgmr.msra.gmra.mrb[6].mxu0 %vm244_vm2, %v419_v12  ;;  %4019 = vmatprep.subr.mxu1 %v4522_v15 }
 0x4ff   :  { %4015 = vmatpush3.xpose.msk.msra.mxu0 %vm244_vm2, %v653_v6  ;;  %4016 = vmatprep.mubr.msk.f32.mxu0 %vm4523_vm1, %v4522_v15 }
 0x500   :  { %4012 = vmatmul.mubr.msk.f32.vlgmr.msra.gmra.mrb[4].mxu1 %vm244_vm2, %v573_v13  ;;  %4024 = vmatprep.subr.mxu0 %v4522_v15 }
 0x501   :  { %4021 = vmatprep.mubr.msk.f32.mxu1 %vm4523_vm1, %v4522_v15 }
 0x502   :  { %4017 = vmatmul.mubr.msk.f32.vlgmr.msra.gmra.mrb[8].mxu0 %vm244_vm2, %v651_v14 }
 0x503   :  { %4026 = vmatprep.mubr.msk.f32.mxu0 %vm4523_vm1, %v4522_v15 }
 0x5cf   :  { %v4791_v16 = vpop.f32.mrb[2].mxu1 }
 0x5d0   :  { %v4003_v17 = vpop.f32.mrb[3].mxu1 }
 0x5d1   :  { %v4793_v18 = vpop.f32.mrb[6].mxu0 }
 0x5d2   :  { %v4008_v19 = vpop.f32.mrb[7].mxu0 }
 0x5d3   :  { %v646_v20 = vpop.f32.mrb[4].mxu1 }
 0x5d4   :  { %v647_v21 = vadd.f32 %v4748_v45, %v646_v20  ;;  %v4013_v22 = vpop.f32.mrb[5].mxu1 }
 0x5d5   :  { %v724_v23 = vpop.f32.mrb[8].mxu0 }
 0x5d6   :  { %v725_v24 = vadd.f32 %v4753_v47, %v724_v23  ;;  %v4018_v25 = vpop.f32.mrb[9].mxu0  ;;  %v728_v26 = vsel %vm244_vm2, %v647_v21, -inf }
 0x5d7   :  { %729 = vmax.xlane.f32.xlu0 %v728_v26 }
 0x5d8   :  { %v731_v27 = vsel %vm244_vm2, %v725_v24, -inf }
 0x5d9   :  { %732 = vmax.xlane.f32.xlu1 %v731_v27 }
 0x5ea   :  { %826 = vrot.lane.b32.xlu1 %v4721_v39, %s4528_s21 }
 0x5ed   :  { %750 = vrot.lane.b32.xlu0 %v4719_v36, %s4528_s21 }
 0x5ee   :  { %904 = vrot.lane.b32.xlu1 %v4719_v36, %s4529_s23 }
 0x5f2   :  { %982 = vrot.lane.b32.xlu1 %v4721_v39, %s4529_s23 }
 0x5f6   :  { %980 = vrot.lane.b32.xlu1 %v4736_v44, %s4530_s6 }
 0x664   :  { %v730_v28 = vpop.xlane.xlu0 %729 }
 0x665   :  { %v734_v29 = vsub.f32 %v647_v21, %v730_v28 }
 0x666   :  { %v733_v30 = vpop.xlane.xlu1 %732 }
 0x667   :  { %v736_v31 = vmul.f32 1.442695, %v734_v29  ;;  %v735_v32 = vsub.f32 %v725_v24, %v733_v30 }
 0x668   :  { %v751_v33 = vpop.permute.xlu0 %750 }
 0x669   :  { %4301 = vpow2.f32 %v736_v31  ;;  %v738_v34 = vmul.f32 1.442695, %v735_v32  ;;  %4020 = vmatpush3.msra.mxu1 %v751_v33 }
 0x66a   :  { %v827_v35 = vpop.permute.xlu1 %826  ;;  %4029 = vmatprep.subr.mxu1 %v4522_v15 }
 0x66b   :  { %4303 = vpow2.f32 %v738_v34  ;;  %4025 = vmatpush3.msra.mxu0 %v827_v35 }
 0x66c   :  { %4034 = vmatprep.subr.mxu0 %v4522_v15 }
 0x66e   :  { %v905_v48 = vpop.permute.xlu1 %904 }
 0x672   :  { %v983_v52 = vpop.permute.xlu1 %982 }
 0x673   :  { %v4302_v37 = vpop.eup %4301 }
 0x674   :  { %v740_v38 = vsel %vm244_vm2, %v4302_v37, 0.0 }
 0x675   :  { %v4304_v40 = vpop.eup %4303  ;;  %741 = vadd.xlane.f32.xlu0 %v740_v38 }
 0x676   :  { %v743_v41 = vsel %vm244_vm2, %v4304_v40, 0.0  ;;  %v981_v55 = vpop.permute.xlu1 %980 }
 0x679   :  { %744 = vadd.xlane.f32.xlu0 %v743_v41 }
 0x68f   :  { %902 = vrot.lane.b32.xlu0 %v4729_v43, %s4530_s6 }
 0x702   :  { %v742_v42 = vpop.xlane.xlu0 %741 }
 0x703   :  { %4305 = vrcp.f32 %v742_v42 }
 0x706   :  { %v745_v46 = vpop.xlane.xlu0 %744 }
 0x707   :  { %4307 = vrcp.f32 %v745_v46 }
 0x70a   :  { %v903_v54 = vpop.permute.xlu0 %902 }
 0x70d   :  { %v4306_v49 = vpop.eup %4305 }
 0x70e   :  { %v748_v50 = vmul.f32 %v4306_v49, %v4302_v37 }
 0x710   :  { %4022 = vmatmul.mubr.msk.f32.vlgmr.msra.gmra.mrb[6].mxu1 %vm244_vm2, %v748_v50 }
 0x711   :  { %v4308_v51 = vpop.eup %4307  ;;  %4030 = vmatpush3.xpose.msk.msra.mxu1 %vm244_vm2, %v905_v48  ;;  %4031 = vmatprep.mubr.msk.f32.mxu1 %vm4523_vm1, %v4522_v15 }
 0x712   :  { %v749_v53 = vmul.f32 %v4308_v51, %v4304_v40  ;;  %4039 = vmatprep.subr.mxu1 %v4522_v15 }
 0x714   :  { %4027 = vmatmul.mubr.msk.f32.vlgmr.msra.gmra.mrb[10].mxu0 %vm244_vm2, %v749_v53  ;;  %4032 = vmatmul.mubr.msk.f32.vlgmr.msra.gmra.mrb[8].mxu1 %vm244_vm2, %v903_v54 }
 0x715   :  { %4035 = vmatpush3.xpose.msk.msra.mxu0 %vm244_vm2, %v983_v52  ;;  %4036 = vmatprep.mubr.msk.f32.mxu0 %vm4523_vm1, %v4522_v15 }
 0x716   :  { %4044 = vmatprep.subr.mxu0 %v4522_v15  ;;  %4041 = vmatprep.mubr.msk.f32.mxu1 %vm4523_vm1, %v4522_v15 }
 0x718   :  { %4037 = vmatmul.mubr.msk.f32.vlgmr.msra.gmra.mrb[12].mxu0 %vm244_vm2, %v981_v55 }
 0x719   :  { %4046 = vmatprep.mubr.msk.f32.mxu0 %vm4523_vm1, %v4522_v15 }
 0x7e3   :  { %v4831_v56 = vpop.f32.mrb[6].mxu1 }
 0x7e4   :  { %v4023_v57 = vpop.f32.mrb[7].mxu1 }
 0x7e7   :  { %v4833_v58 = vpop.f32.mrb[10].mxu0  ;;  %v976_v59 = vpop.f32.mrb[8].mxu1 }
 0x7e8   :  { %v4239_v60 = vpack.i.bf16 %v4833_v58, %v4831_v56  ;;  %v977_v61 = vadd.f32 %v4748_v45, %v976_v59  ;;  %v4028_v62 = vpop.f32.mrb[11].mxu0  ;;  %v4033_v63 = vpop.f32.mrb[9].mxu1 }
 0x7ea   :  { %v1058_v2 = vsel %vm244_vm2, %v977_v61, -inf }
 0x7eb   :  { %1059 = vmax.xlane.f32.xlu0 %v1058_v2  ;;  %v1054_v3 = vpop.f32.mrb[12].mxu0 }
 0x7ec   :  { %v1055_v4 = vadd.f32 %v4753_v47, %v1054_v3  ;;  %v4038_v5 = vpop.f32.mrb[13].mxu0 }
 0x7ee   :  { %v1061_v6 = vsel %vm244_vm2, %v1055_v4, -inf }
 0x7ef   :  { %1062 = vmax.xlane.f32.xlu1 %v1061_v6 }
 0x800   :  { %1156 = vrot.lane.b32.xlu1 %v4721_v39, %s4531_s22 }
 0x801   :  { %1080 = vrot.lane.b32.xlu0 %v4719_v36, %s4531_s22 }
 0x804   :  { %1234 = vrot.lane.b32.xlu1 %v4719_v36, %s4532_s9 }
 0x808   :  { %1312 = vrot.lane.b32.xlu1 %v4721_v39, %s4532_s9 }
 0x80c   :  { %1310 = vrot.lane.b32.xlu1 %v4736_v44, %s4533_s17 }
 0x878   :  { %v1060_v7 = vpop.xlane.xlu0 %1059 }
 0x879   :  { %v1064_v8 = vsub.f32 %v977_v61, %v1060_v7 }
 0x87b   :  { %v1066_v9 = vmul.f32 1.442695, %v1064_v8 }
 0x87c   :  { %v1081_v10 = vpop.permute.xlu0 %1080  ;;  %v1063_v11 = vpop.xlane.xlu1 %1062 }
 0x87d   :  { %4309 = vpow2.f32 %v1066_v9  ;;  %v1065_v12 = vsub.f32 %v1055_v4, %v1063_v11  ;;  %4040 = vmatpush3.msra.mxu1 %v1081_v10  ;;  %v4272_v4 = vld [vmem:[%s5285_s4 + $0x8] sm:$0xff]  }
 0x87e   :  { %4049 = vmatprep.subr.mxu1 %v4522_v15 }
 0x87f   :  { %v1068_v13 = vmul.f32 1.442695, %v1065_v12 }
 0x880   :  { %v1157_v14 = vpop.permute.xlu1 %1156 }
 0x881   :  { %4311 = vpow2.f32 %v1068_v13  ;;  %4045 = vmatpush3.msra.mxu0 %v1157_v14 }
 0x882   :  { %4054 = vmatprep.subr.mxu0 %v4522_v15 }
 0x884   :  { %v1235_v23 = vpop.permute.xlu1 %1234 }
 0x887   :  { %v4310_v17 = vpop.eup %4309 }
 0x888   :  { %v1070_v19 = vsel %vm244_vm2, %v4310_v17, 0.0  ;;  %v1313_v27 = vpop.permute.xlu1 %1312 }
 0x889   :  { %1071 = vadd.xlane.f32.xlu0 %v1070_v19 }
 0x88b   :  { %v4312_v44 = vpop.eup %4311 }
 0x88c   :  { %v1073_v20 = vsel %vm244_vm2, %v4312_v44, 0.0  ;;  %v1311_v29 = vpop.permute.xlu1 %1310 }
 0x88d   :  { %1074 = vadd.xlane.f32.xlu0 %v1073_v20 }
 0x8a3   :  { %1232 = vrot.lane.b32.xlu0 %v4729_v43, %s4533_s17 }
 0x916   :  { %v1072_v21 = vpop.xlane.xlu0 %1071 }
 0x917   :  { %4313 = vrcp.f32 %v1072_v21 }
 0x91a   :  { %v1075_v22 = vpop.xlane.xlu0 %1074 }
 0x91b   :  { %4315 = vrcp.f32 %v1075_v22 }
 0x91e   :  { %v1233_v43 = vpop.permute.xlu0 %1232 }
 0x921   :  { %v4314_v24 = vpop.eup %4313 }
 0x922   :  { %v1078_v25 = vmul.f32 %v4314_v24, %v4310_v17 }
 0x924   :  { %4042 = vmatmul.mubr.msk.f32.vlgmr.msra.gmra.mrb[10].mxu1 %vm244_vm2, %v1078_v25 }
 0x925   :  { %v4316_v26 = vpop.eup %4315  ;;  %4050 = vmatpush3.xpose.msk.msra.mxu1 %vm244_vm2, %v1235_v23  ;;  %4051 = vmatprep.mubr.msk.f32.mxu1 %vm4523_vm1, %v4522_v15 }
 0x926   :  { %v1079_v28 = vmul.f32 %v4316_v26, %v4312_v44  ;;  %4059 = vmatprep.subr.mxu1 %v4522_v15 }
 0x928   :  { %4047 = vmatmul.mubr.msk.f32.vlgmr.msra.gmra.mrb[14].mxu0 %vm244_vm2, %v1079_v28  ;;  %4052 = vmatmul.mubr.msk.f32.vlgmr.msra.gmra.mrb[12].mxu1 %vm244_vm2, %v1233_v43 }
 0x929   :  { %4055 = vmatpush3.xpose.msk.msra.mxu0 %vm244_vm2, %v1313_v27  ;;  %4056 = vmatprep.mubr.msk.f32.mxu0 %vm4523_vm1, %v4522_v15 }
 0x92a   :  { %4064 = vmatprep.subr.mxu0 %v4522_v15  ;;  %4061 = vmatprep.mubr.msk.f32.mxu1 %vm4523_vm1, %v4522_v15 }
 0x92c   :  { %4057 = vmatmul.mubr.msk.f32.vlgmr.msra.gmra.mrb[16].mxu0 %vm244_vm2, %v1311_v29 }
 0x92d   :  { %4066 = vmatprep.mubr.msk.f32.mxu0 %vm4523_vm1, %v4522_v15 }
 0x9f7   :  { %v1152_v30 = vpop.f32.mrb[10].mxu1 }
 0x9f8   :  { %v4043_v31 = vpop.f32.mrb[11].mxu1 }
 0x9fb   :  { %v1228_v32 = vpop.f32.mrb[14].mxu0  ;;  %v1306_v33 = vpop.f32.mrb[12].mxu1 }
 0x9fc   :  { %v4244_v34 = vpack.i.bf16 %v1228_v32, %v1152_v30  ;;  %v1307_v35 = vadd.f32 %v4748_v45, %v1306_v33  ;;  %v4048_v37 = vpop.f32.mrb[15].mxu0  ;;  %v4053_v38 = vpop.f32.mrb[13].mxu1 }
 0x9fe   :  { %v1388_v40 = vsel %vm244_vm2, %v1307_v35, -inf }
 0x9ff   :  { %1389 = vmax.xlane.f32.xlu0 %v1388_v40  ;;  %v1384_v41 = vpop.f32.mrb[16].mxu0 }
 0xa00   :  { %v1385_v42 = vadd.f32 %v4753_v47, %v1384_v41  ;;  %v4058_v46 = vpop.f32.mrb[17].mxu0 }
 0xa02   :  { %v1391_v48 = vsel %vm244_vm2, %v1385_v42, -inf }
 0xa03   :  { %1392 = vmax.xlane.f32.xlu1 %v1391_v48 }
 0xa14   :  { %1486 = vrot.lane.b32.xlu1 %v4721_v39, %s4534_s25 }
 0xa18   :  { %4240 = vrot.lane.b32.xlu1 %v4239_v60, %s5301_s24 }
 0xa1c   :  { %4245 = vrot.lane.b32.xlu1 %v4244_v34, %s5300_s26 }
 0xa8c   :  { %v1390_v49 = vpop.xlane.xlu0 %1389 }
 0xa8d   :  { %v1394_v50 = vsub.f32 %v1307_v35, %v1390_v49 }
 0xa8f   :  { %v1396_v51 = vmul.f32 1.442695, %v1394_v50  ;;  %v4273_v50 = vld [vmem:[%s5289_s8] sm:$0xff]  }
 0xa90   :  { %v1393_v52 = vpop.xlane.xlu1 %1392 }
 0xa91   :  { %4317 = vpow2.f32 %v1396_v51  ;;  %v1395_v53 = vsub.f32 %v1385_v42, %v1393_v52  ;;  %v4274_v51 = vld [vmem:[%s5289_s8 + $0x8] sm:$0xff]   ;;  %v4275_v52 = vld [vmem:[%s5291_s10] sm:$0xff]  }
 0xa93   :  { %v1398_v54 = vmul.f32 1.442695, %v1395_v53  ;;  %v4276_v53 = vld [vmem:[%s5291_s10 + $0x8] sm:$0xff]  }
 0xa94   :  { %v1487_v55 = vpop.permute.xlu1 %1486 }
 0xa95   :  { %4319 = vpow2.f32 %v1398_v54  ;;  %4065 = vmatpush3.msra.mxu0 %v1487_v55 }
 0xa96   :  { %4077 = vmatprep.subr.bf16.mxu0 %v4522_v15 }
 0xa98   :  { %v4241_v10 = vpop.permute.xlu1 %4240 }
 0xa99   :  { %v4243_v12 = vunpack.i.h.bf16 %v4241_v10  ;;  %v4242_v13 = vunpack.i.l.bf16 %v4241_v10 }
 0xa9b   :  { %v4318_v39 = vpop.eup %4317  ;;  %v1587_v44 = vsel %vm244_vm2, %v4793_v18, %v4243_v12  ;;  %v1586_v20 = vsel %vm244_vm2, %v4791_v16, %v4242_v13  ;;  %v3805_v18 = vld [vmem:[#allocation5] ss:$0 sm:$0xff] }
 0xa9c   :  { %v1400_v57 = vsel %vm244_vm2, %v4318_v39, 0.0  ;;  %v4246_v11 = vpop.permute.xlu1 %4245 }
 0xa9d   :  { %1401 = vadd.xlane.f32.xlu0 %v1400_v57  ;;  %v4248_v14 = vunpack.i.h.bf16 %v4246_v11  ;;  %v4247_v17 = vunpack.i.l.bf16 %v4246_v11 }
 0xa9f   :  { %v4320_v56 = vpop.eup %4319  ;;  %v1589_v23 = vsel %vm1588_vm3, %v1586_v20, %v4247_v17  ;;  %v1590_v24 = vsel %vm1588_vm3, %v1587_v44, %v4248_v14 }
 0xaa0   :  { %v1403_v58 = vsel %vm244_vm2, %v4320_v56, 0.0 }
 0xaa1   :  { %1404 = vadd.xlane.f32.xlu0 %v1403_v58 }
 0xab7   :  { %1410 = vrot.lane.b32.xlu0 %v4719_v36, %s4534_s25  ;;  %v4271_v36 = vld [vmem:[%s5285_s4] sm:$0xff]  }
 0xb2a   :  { %v1402_v59 = vpop.xlane.xlu0 %1401 }
 0xb2b   :  { %4321 = vrcp.f32 %v1402_v59 }
 0xb2e   :  { %v1405_v60 = vpop.xlane.xlu0 %1404 }
 0xb2f   :  { %4323 = vrcp.f32 %v1405_v60 }
 0xb32   :  { %v1411_v61 = vpop.permute.xlu0 %1410 }
 0xb33   :  { %4060 = vmatpush3.msra.mxu1 %v1411_v61  ;;  %v3809_v61 = vld [vmem:[%s5293_s12] ss:$0 sm:$0xff] }
 0xb34   :  { %4069 = vmatprep.subr.bf16.mxu1 %v4522_v15 }
 0xb35   :  { %v4322_v62 = vpop.eup %4321 }
 0xb36   :  { %v1408_v63 = vmul.f32 %v4322_v62, %v4318_v39 }
 0xb38   :  { %4062 = vmatmul.mubr.msk.f32.vlgmr.msra.gmra.mrb[14].mxu1 %vm244_vm2, %v1408_v63 }
 0xb39   :  { %v4324_v2 = vpop.eup %4323  ;;  %4073 = vmatprep.mubr.msk.bf16.mxu1 %vm4523_vm1, %v4522_v15  ;;  %4070 = vmatpush3.bf16.msra.mxu1 %v4271_v36 }
 0xb3a   :  { %v1409_v3 = vmul.f32 %v4324_v2, %v4320_v56  ;;  %4071 = vmatprep.subr.bf16.mxu1 %v4522_v15 }
 0xb3c   :  { %4067 = vmatmul.mubr.msk.f32.vlgmr.msra.gmra.mrb[18].mxu0 %vm244_vm2, %v1409_v3  ;;  %v3810_v3 = vld [vmem:[%s5294_s13] ss:$0 sm:$0xff] }
 0xb3d   :  { %4081 = vmatprep.mubr.msk.bf16.mxu0 %vm4523_vm1, %v4522_v15  ;;  %4072 = vmatpush3.bf16.msra.mxu1 %v4272_v4 }
 0xb3e   :  { %4085 = vmatprep.subr.bf16.mxu1 %v4522_v15  ;;  %4078 = vmatpush3.bf16.msra.mxu0 %v4273_v50 }
 0xb3f   :  { %4079 = vmatprep.subr.bf16.mxu0 %v4522_v15 }
 0xb42   :  { %4080 = vmatpush3.bf16.msra.mxu0 %v4274_v51 }
 0xb43   :  { %4097 = vmatprep.subr.bf16.mxu0 %v4522_v15 }
 0xc0b   :  { %v1482_v5 = vpop.f32.mrb[14].mxu1 }
 0xc0c   :  { %v4063_v6 = vpop.f32.mrb[15].mxu1 }
 0xc0f   :  { %v1558_v7 = vpop.f32.mrb[18].mxu0 }
 0xc10   :  { %v4249_v8 = vpack.i.bf16 %v1558_v7, %v1482_v5  ;;  %v4068_v9 = vpop.f32.mrb[19].mxu0  ;;  %v4277_v7 = vld [vmem:[%s5291_s10 + $0x10] sm:$0xff]  }
 0xc11   :  { %v3811_v9 = vld [vmem:[#allocation10] ss:$0 sm:$0xff] }
 0xc12   :  { %4250 = vrot.lane.b32.xlu0 %v4249_v8, %s5299_s29  ;;  %v4278_v8 = vld [vmem:[%s5291_s10 + $0x18] sm:$0xff]  }
 0xc84   :  { %v4251_v19 = vpop.permute.xlu0 %4250 }
 0xc85   :  { %v4253_v21 = vunpack.i.h.bf16 %v4251_v19  ;;  %v4252_v22 = vunpack.i.l.bf16 %v4251_v19 }
 0xc87   :  { %v1593_v25 = vsel %vm1591_vm4, %v1590_v24, %v4253_v21  ;;  %v1592_v26 = vsel %vm1591_vm4, %v1589_v23, %v4252_v22  ;;  %v3815_v21 = vld [vmem:[%s5292_s11] ss:$0 sm:$0xff] }
 0xc88   :  { %v1594_v27 = vpack.c.bf16 %v1593_v25, %v1592_v26 }
 0xc8a   :  { %4074 = vmatmul.mubr.msk.bf16.vlgmr.msra.gmra.mrb[16].mxu1 %vm121_vm0, %v1594_v27 }
 0xc8b   :  { %4093 = vmatprep.mubr.msk.bf16.mxu1 %vm4523_vm1, %v4522_v15  ;;  %4086 = vmatpush3.bf16.msra.mxu1 %v4275_v52  ;;  %v3821_v52 = vld [vmem:[#allocation7 + $0x1] ss:$0 sm:$0xff] }
 0xc8c   :  { %4087 = vmatprep.subr.bf16.mxu1 %v4522_v15 }
 0xc8f   :  { %4088 = vmatpush3.bf16.msra.mxu1 %v4276_v53 }
 0xc90   :  { %4089 = vmatprep.subr.bf16.mxu1 %v4522_v15 }
 0xc93   :  { %4090 = vmatpush3.bf16.msra.mxu1 %v4277_v7 }
 0xc94   :  { %4091 = vmatprep.subr.bf16.mxu1 %v4522_v15 }
 0xc97   :  { %4092 = vmatpush3.bf16.msra.mxu1 %v4278_v8 }
 0xc98   :  { %4115 = vmatprep.subr.mxu1 %v4522_v15 }
 0xd5d   :  { %v1653_v28 = vpop.f32.mrb[16].mxu1 }
 0xd5e   :  { %v1654_v43 = vadd.f32 %v3805_v18, %v1653_v28  ;;  %v4075_v16 = vpop.f32.mrb[17].mxu1 }
 0xd5f   :  { %v1656_v29 = vpop.f32.mrb[18].mxu1 }
 0xd60   :  { %v4917_v30 = vadd.f32 %v1654_v43, %v4687_v0  ;;  %v1657_v31 = vadd.f32 %v3805_v18, %v1656_v29  ;;  %v4076_v32 = vpop.f32.mrb[19].mxu1 }
 0xd62   :  { %v4920_v33 = vadd.f32 %v1657_v31, %v4689_v1  ;;  %v1664_v34 = vsel %vm121_vm0, %v4917_v30, 0.0 }
 0xd63   :  { %1665 = vadd.xlane.f32.xlu1 %v1664_v34 }
 0xd64   :  { %v1667_v35 = vsel %vm121_vm0, %v4920_v33, 0.0 }
 0xd65   :  { %1668 = vadd.xlane.f32.xlu0 %v1667_v35 }
 0xdf0   :  { %v1666_v37 = vpop.xlane.xlu1 %1665 }
 0xdf1   :  { %v1670_v38 = vmul.f32 0.03125, %v1666_v37 }
 0xdf2   :  { %v1669_v40 = vpop.xlane.xlu0 %1668 }
 0xdf3   :  { %v1672_v41 = vsub.f32 %v4917_v30, %v1670_v38  ;;  %v1671_v0 = vmul.f32 0.03125, %v1669_v40 }
 0xdf5   :  { %v1673_v42 = vsub.f32 %v4920_v33, %v1671_v0  ;;  %v1674_v46 = vmul.f32 %v1672_v41, %v1672_v41  ;;  %v4280_v0 = vld [vmem:[%s5283_s2 + $0x18] sm:$0xff]  }
 0xdf7   :  { %v1676_v1 = vsel %vm121_vm0, %v1674_v46, 0.0  ;;  %v1675_v48 = vmul.f32 %v1673_v42, %v1673_v42 }
 0xdf8   :  { %1677 = vadd.xlane.f32.xlu0 %v1676_v1 }
 0xdf9   :  { %v1679_v49 = vsel %vm121_vm0, %v1675_v48, 0.0 }
 0xdfc   :  { %1680 = vadd.xlane.f32.xlu0 %v1679_v49 }
 0xe85   :  { %v1678_v54 = vpop.xlane.xlu0 %1677 }
 0xe86   :  { %v1682_v55 = vmul.f32 0.03125, %v1678_v54 }
 0xe88   :  { %v1684_v39 = vadd.f32 1e-05, %v1682_v55 }
 0xe89   :  { %v1681_v57 = vpop.xlane.xlu0 %1680 }
 0xe8a   :  { %4325 = vrsqrt.f32 %v1684_v39  ;;  %v1683_v56 = vmul.f32 0.03125, %v1681_v57  ;;  %v3822_v57 = vld [vmem:[#allocation8 + $0x1] ss:$0 sm:$0xff] }
 0xe8c   :  { %v1685_v58 = vadd.f32 1e-05, %v1683_v56 }
 0xe8e   :  { %4327 = vrsqrt.f32 %v1685_v58 }
 0xe94   :  { %v4326_v59 = vpop.eup %4325 }
 0xe95   :  { %v1688_v60 = vmul.f32 %v4326_v59, %v1672_v41  ;;  %v4279_v41 = vld [vmem:[%s5283_s2 + $0x10] sm:$0xff]  }
 0xe97   :  { %v1694_v63 = vmul.f32 %v3809_v61, %v1688_v60 }
 0xe98   :  { %v4328_v62 = vpop.eup %4327 }
 0xe99   :  { %v1689_v2 = vmul.f32 %v4328_v62, %v1673_v42  ;;  %v1700_v4 = vadd.f32 %v3810_v3, %v1694_v63 }
 0xe9b   :  { %v1695_v36 = vmul.f32 %v3809_v61, %v1689_v2  ;;  %v3827_v61 = vld [vmem:[%s5284_s3 + $0x1] ss:$0 sm:$0xff] }
 0xe9d   :  { %v1701_v5 = vadd.f32 %v3810_v3, %v1695_v36 }
 0xe9f   :  { %v1702_v6 = vpack.c.bf16 %v1701_v5, %v1700_v4 }
 0xea1   :  { %4082 = vmatmul.mubr.msk.bf16.vlgmr.msra.gmra.mrb[20].mxu0 %vm121_vm0, %v1702_v6 }
 0xea2   :  { %4101 = vmatprep.mubr.msk.bf16.mxu0 %vm4523_vm1, %v4522_v15  ;;  %4098 = vmatpush3.bf16.msra.mxu0 %v4279_v41 }
 0xea3   :  { %4099 = vmatprep.subr.bf16.mxu0 %v4522_v15 }
 0xea6   :  { %4100 = vmatpush3.bf16.msra.mxu0 %v4280_v0 }
 0xea7   :  { %4105 = vmatprep.subr.mxu0 %v4522_v15 }
 0xf74   :  { %v1761_v10 = vpop.f32.mrb[20].mxu0 }
 0xf75   :  { %v1762_v11 = vadd.f32 %v3811_v9, %v1761_v10  ;;  %v4083_v12 = vpop.f32.mrb[21].mxu0 }
 0xf76   :  { %v1764_v13 = vpop.f32.mrb[22].mxu0 }
 0xf77   :  { %v1765_v14 = vadd.f32 %v3811_v9, %v1764_v13  ;;  %v4084_v17 = vpop.f32.mrb[23].mxu0  ;;  %v1768_v19 = vmax.f32 %v1762_v11, 0.0 }
 0xf79   :  { %v1769_v44 = vmax.f32 %v1765_v14, 0.0 }
 0xf7b   :  { %v1770_v20 = vpack.c.bf16 %v1769_v44, %v1768_v19 }
 0xf7d   :  { %4094 = vmatmul.mubr.msk.bf16.vlgmr.msra.gmra.mrb[20].mxu1 %vm1808_vm5, %v1770_v20 }
 0xf7e   :  { %4117 = vmatprep.mubr.msk.f32.mxu1 %vm4523_vm1, %v4522_v15 }
0x1050   :  { %v1846_v22 = vpop.f32.mrb[20].mxu1 }
0x1051   :  { %v1847_v23 = vadd.f32 %v3815_v21, %v1846_v22  ;;  %v4095_v24 = vpop.f32.mrb[21].mxu1 }
0x1052   :  { %v1849_v25 = vpop.f32.mrb[22].mxu1 }
0x1053   :  { %v4970_v26 = vadd.f32 %v1847_v23, %v4917_v30  ;;  %v1850_v27 = vadd.f32 %v3815_v21, %v1849_v25  ;;  %v4096_v18 = vpop.f32.mrb[23].mxu1 }
0x1055   :  { %v4973_v28 = vadd.f32 %v1850_v27, %v4920_v33  ;;  %v1857_v43 = vsel %vm121_vm0, %v4970_v26, 0.0 }
0x1056   :  { %1858 = vadd.xlane.f32.xlu1 %v1857_v43 }
0x1057   :  { %v1860_v16 = vsel %vm121_vm0, %v4973_v28, 0.0 }
0x1058   :  { %1861 = vadd.xlane.f32.xlu0 %v1860_v16 }
0x10e3   :  { %v1859_v29 = vpop.xlane.xlu1 %1858 }
0x10e4   :  { %v1863_v31 = vmul.f32 0.03125, %v1859_v29 }
0x10e5   :  { %v1862_v32 = vpop.xlane.xlu0 %1861 }
0x10e6   :  { %v1865_v34 = vsub.f32 %v4970_v26, %v1863_v31  ;;  %v1864_v30 = vmul.f32 0.03125, %v1862_v32 }
0x10e8   :  { %v1866_v35 = vsub.f32 %v4973_v28, %v1864_v30  ;;  %v1867_v37 = vmul.f32 %v1865_v34, %v1865_v34 }
0x10ea   :  { %v1869_v33 = vsel %vm121_vm0, %v1867_v37, 0.0  ;;  %v1868_v38 = vmul.f32 %v1866_v35, %v1866_v35 }
0x10eb   :  { %1870 = vadd.xlane.f32.xlu1 %v1869_v33 }
0x10ec   :  { %v1872_v40 = vsel %vm121_vm0, %v1868_v38, 0.0 }
0x10ed   :  { %1873 = vadd.xlane.f32.xlu0 %v1872_v40 }
0x1178   :  { %v1871_v42 = vpop.xlane.xlu1 %1870 }
0x1179   :  { %v1875_v46 = vmul.f32 0.03125, %v1871_v42 }
0x117a   :  { %v1874_v1 = vpop.xlane.xlu0 %1873 }
0x117b   :  { %v1877_v48 = vadd.f32 1e-05, %v1875_v46  ;;  %v1876_v49 = vmul.f32 0.03125, %v1874_v1 }
0x117d   :  { %4329 = vrsqrt.f32 %v1877_v48  ;;  %v1878_v50 = vadd.f32 1e-05, %v1876_v49 }
0x117f   :  { %4331 = vrsqrt.f32 %v1878_v50 }
0x1187   :  { %v4330_v51 = vpop.eup %4329 }
0x1188   :  { %v1881_v53 = vmul.f32 %v4330_v51, %v1865_v34 }
0x1189   :  { %v4332_v54 = vpop.eup %4331 }
0x118a   :  { %v1887_v55 = vmul.f32 %v3821_v52, %v1881_v53  ;;  %v1882_v39 = vmul.f32 %v4332_v54, %v1866_v35 }
0x118c   :  { %v1888_v56 = vmul.f32 %v3821_v52, %v1882_v39  ;;  %v1893_v58 = vadd.f32 %v3822_v57, %v1887_v55 }
0x118e   :  { %v1894_v59 = vadd.f32 %v3822_v57, %v1888_v56 }
0x1190   :  { %v1895_v60 = vpack.c.bf16 %v1894_v59, %v1893_v58 }
0x1192   :  { %4102 = vmatmul.mubr.msk.bf16.vlgmr.msra.gmra.mrb[24].mxu0 %vm121_vm0, %v1895_v60 }
0x1193   :  { %4107 = vmatprep.mubr.msk.f32.mxu0 %vm4523_vm1, %v4522_v15 }
0x1265   :  { %v1955_v62 = vpop.f32.mrb[24].mxu0 }
0x1266   :  { %v4997_v63 = vadd.f32 %v3827_v61, %v1955_v62  ;;  %v4103_v2 = vpop.f32.mrb[25].mxu0 }
0x1267   :  { %v1958_v3 = vpop.f32.mrb[26].mxu0 }
0x1268   :  { %v4999_v36 = vadd.f32 %v3827_v61, %v1958_v3  ;;  %1965 = vrot.lane.b32.xlu1 %v4997_v63, %s4524_s19  ;;  %v4104_v4 = vpop.f32.mrb[27].mxu0  ;;  %v5007_v6 = vmul.f32 0.35355338, %v4997_v63 }
0x126a   :  { %2043 = vrot.lane.b32.xlu0 %v4999_v36, %s4524_s19  ;;  %v5016_v8 = vmul.f32 0.35355338, %v4999_v36 }
0x12da   :  { %v1966_v5 = vpop.permute.xlu1 %1965 }
0x12db   :  { %4106 = vmatpush3.xpose.msk.msra.mxu0 %vm244_vm2, %v1966_v5 }
0x12dc   :  { %4110 = vmatprep.subr.mxu0 %v4522_v15  ;;  %v2044_v7 = vpop.permute.xlu0 %2043 }
0x12de   :  { %4108 = vmatmul.mubr.msk.f32.vlgmr.msra.gmra.mrb[28].mxu0 %vm244_vm2, %v5007_v6 }
0x12df   :  { %4111 = vmatpush3.xpose.msk.msra.mxu0 %vm244_vm2, %v2044_v7  ;;  %4112 = vmatprep.mubr.msk.f32.mxu0 %vm4523_vm1, %v4522_v15 }
0x12e0   :  { %4120 = vmatprep.subr.mxu0 %v4522_v15 }
0x12e2   :  { %4113 = vmatmul.mubr.msk.f32.vlgmr.msra.gmra.mrb[30].mxu0 %vm244_vm2, %v5016_v8 }
0x12e3   :  { %4122 = vmatprep.mubr.msk.f32.mxu0 %vm4523_vm1, %v4522_v15 }
0x13b1   :  { %v2038_v9 = vpop.f32.mrb[28].mxu0 }
0x13b2   :  { %v2039_v10 = vadd.f32 %v4748_v45, %v2038_v9  ;;  %v4109_v11 = vpop.f32.mrb[29].mxu0 }
0x13b4   :  { %v2120_v12 = vsel %vm244_vm2, %v2039_v10, -inf }
0x13b5   :  { %2121 = vmax.xlane.f32.xlu1 %v2120_v12  ;;  %v2116_v13 = vpop.f32.mrb[30].mxu0 }
0x13b6   :  { %v2117_v14 = vadd.f32 %v4753_v47, %v2116_v13  ;;  %v4114_v17 = vpop.f32.mrb[31].mxu0 }
0x13b8   :  { %v2123_v19 = vsel %vm244_vm2, %v2117_v14, -inf }
0x13b9   :  { %2124 = vmax.xlane.f32.xlu0 %v2123_v19 }
0x13c6   :  { %2142 = vrot.lane.b32.xlu1 %v4997_v63, %s4525_s30 }
0x13ca   :  { %2296 = vrot.lane.b32.xlu1 %v4997_v63, %s4526_s18 }
0x13ce   :  { %2374 = vrot.lane.b32.xlu1 %v4999_v36, %s4526_s18 }
0x13cf   :  { %2218 = vrot.lane.b32.xlu0 %v4999_v36, %s4525_s30 }
0x1442   :  { %v2122_v44 = vpop.xlane.xlu1 %2121 }
0x1443   :  { %v2126_v20 = vsub.f32 %v2039_v10, %v2122_v44 }
0x1445   :  { %v2128_v21 = vmul.f32 1.442695, %v2126_v20 }
0x1446   :  { %v2143_v22 = vpop.permute.xlu1 %2142  ;;  %v2125_v23 = vpop.xlane.xlu0 %2124 }
0x1447   :  { %4333 = vpow2.f32 %v2128_v21  ;;  %v2127_v24 = vsub.f32 %v2117_v14, %v2125_v23  ;;  %4116 = vmatpush3.msra.mxu1 %v2143_v22  ;;  %v5108_v23 = vld [vmem:[%s5282_s1] ss:$0 sm:$0xff] }
0x1448   :  { %4125 = vmatprep.subr.mxu1 %v4522_v15 }
0x1449   :  { %v2130_v25 = vmul.f32 1.442695, %v2127_v24 }
0x144a   :  { %v2219_v27 = vpop.permute.xlu0 %2218  ;;  %v2297_v31 = vpop.permute.xlu1 %2296 }
0x144b   :  { %4335 = vpow2.f32 %v2130_v25  ;;  %4121 = vmatpush3.msra.mxu0 %v2219_v27 }
0x144c   :  { %4130 = vmatprep.subr.mxu0 %v4522_v15 }
0x144e   :  { %v2375_v32 = vpop.permute.xlu1 %2374 }
0x1451   :  { %v4334_v18 = vpop.eup %4333 }
0x1452   :  { %v2132_v43 = vsel %vm244_vm2, %v4334_v18, 0.0 }
0x1453   :  { %2133 = vadd.xlane.f32.xlu1 %v2132_v43 }
0x1455   :  { %v4336_v16 = vpop.eup %4335 }
0x1456   :  { %v2135_v29 = vsel %vm244_vm2, %v4336_v16, 0.0 }
0x1457   :  { %2136 = vadd.xlane.f32.xlu0 %v2135_v29 }
0x1464   :  { %2294 = vrot.lane.b32.xlu1 %v5007_v6, %s4527_s20 }
0x146d   :  { %2372 = vrot.lane.b32.xlu0 %v5016_v8, %s4527_s20  ;;  %s5305_s20 = smov 16  }
0x14e0   :  { %v2134_v34 = vpop.xlane.xlu1 %2133 }
0x14e1   :  { %4337 = vrcp.f32 %v2134_v34 }
0x14e4   :  { %v2137_v30 = vpop.xlane.xlu0 %2136  ;;  %v2295_v40 = vpop.permute.xlu1 %2294 }
0x14e5   :  { %4339 = vrcp.f32 %v2137_v30 }
0x14e8   :  { %v2373_v41 = vpop.permute.xlu0 %2372 }
0x14eb   :  { %v4338_v35 = vpop.eup %4337 }
0x14ec   :  { %v2140_v37 = vmul.f32 %v4338_v35, %v4334_v18 }
0x14ee   :  { %4118 = vmatmul.mubr.msk.f32.vlgmr.msra.gmra.mrb[24].mxu1 %vm244_vm2, %v2140_v37 }
0x14ef   :  { %v4340_v33 = vpop.eup %4339  ;;  %4126 = vmatpush3.xpose.msk.msra.mxu1 %vm244_vm2, %v2297_v31  ;;  %4127 = vmatprep.mubr.msk.f32.mxu1 %vm4523_vm1, %v4522_v15 }
0x14f0   :  { %v2141_v38 = vmul.f32 %v4340_v33, %v4336_v16  ;;  %4135 = vmatprep.subr.mxu1 %v4522_v15  ;;  %v5115_v16 = vld [vmem:[%s5282_s1 + $0x1] ss:$0 sm:$0xff]  ;;  %s5304_s1 = smov 8  }
0x14f2   :  { %4123 = vmatmul.mubr.msk.f32.vlgmr.msra.gmra.mrb[32].mxu0 %vm244_vm2, %v2141_v38  ;;  %4128 = vmatmul.mubr.msk.f32.vlgmr.msra.gmra.mrb[26].mxu1 %vm244_vm2, %v2295_v40 }
0x14f3   :  { %4131 = vmatpush3.xpose.msk.msra.mxu0 %vm244_vm2, %v2375_v32  ;;  %4132 = vmatprep.mubr.msk.f32.mxu0 %vm4523_vm1, %v4522_v15 }
0x14f4   :  { %4140 = vmatprep.subr.mxu0 %v4522_v15  ;;  %4137 = vmatprep.mubr.msk.f32.mxu1 %vm4523_vm1, %v4522_v15 }
0x14f6   :  { %4133 = vmatmul.mubr.msk.f32.vlgmr.msra.gmra.mrb[34].mxu0 %vm244_vm2, %v2373_v41 }
0x14f7   :  { %4142 = vmatprep.mubr.msk.f32.mxu0 %vm4523_vm1, %v4522_v15 }
0x15c1   :  { %v5059_v0 = vpop.f32.mrb[24].mxu1 }
0x15c2   :  { %v4119_v42 = vpop.f32.mrb[25].mxu1 }
0x15c5   :  { %v5061_v46 = vpop.f32.mrb[32].mxu0  ;;  %v2368_v1 = vpop.f32.mrb[26].mxu1 }
0x15c6   :  { %v2369_v48 = vadd.f32 %v4748_v45, %v2368_v1  ;;  %v4124_v49 = vpop.f32.mrb[33].mxu0  ;;  %v4129_v50 = vpop.f32.mrb[27].mxu1 }
0x15c8   :  { %v2450_v51 = vsel %vm244_vm2, %v2369_v48, -inf }
0x15c9   :  { %2451 = vmax.xlane.f32.xlu1 %v2450_v51  ;;  %v2446_v52 = vpop.f32.mrb[34].mxu0 }
0x15ca   :  { %v2447_v53 = vadd.f32 %v4753_v47, %v2446_v52  ;;  %v4134_v54 = vpop.f32.mrb[35].mxu0 }
0x15cc   :  { %v2453_v55 = vsel %vm244_vm2, %v2447_v53, -inf }
0x15cd   :  { %2454 = vmax.xlane.f32.xlu0 %v2453_v55 }
0x15da   :  { %2472 = vrot.lane.b32.xlu1 %v4997_v63, %s4528_s21 }
0x15de   :  { %2626 = vrot.lane.b32.xlu1 %v4997_v63, %s4529_s23 }
0x15e2   :  { %2704 = vrot.lane.b32.xlu1 %v4999_v36, %s4529_s23 }
0x15e3   :  { %2548 = vrot.lane.b32.xlu0 %v4999_v36, %s4528_s21 }
0x15e6   :  { %2624 = vrot.lane.b32.xlu1 %v5007_v6, %s4530_s6 }
0x1656   :  { %v2452_v45 = vpop.xlane.xlu1 %2451 }
0x1657   :  { %v2456_v47 = vsub.f32 %v2369_v48, %v2452_v45 }
0x1659   :  { %v2458_v39 = vmul.f32 1.442695, %v2456_v47 }
0x165a   :  { %v2473_v57 = vpop.permute.xlu1 %2472  ;;  %v2455_v56 = vpop.xlane.xlu0 %2454 }
0x165b   :  { %4341 = vpow2.f32 %v2458_v39  ;;  %v2457_v58 = vsub.f32 %v2447_v53, %v2455_v56  ;;  %4136 = vmatpush3.msra.mxu1 %v2473_v57 }
0x165c   :  { %4145 = vmatprep.subr.mxu1 %v4522_v15 }
0x165d   :  { %v2460_v59 = vmul.f32 1.442695, %v2457_v58 }
0x165e   :  { %v2549_v60 = vpop.permute.xlu0 %2548  ;;  %v2627_v7 = vpop.permute.xlu1 %2626 }
0x165f   :  { %4343 = vpow2.f32 %v2460_v59  ;;  %4141 = vmatpush3.msra.mxu0 %v2549_v60 }
0x1660   :  { %4150 = vmatprep.subr.mxu0 %v4522_v15 }
0x1662   :  { %v2705_v10 = vpop.permute.xlu1 %2704 }
0x1665   :  { %v4342_v61 = vpop.eup %4341 }
0x1666   :  { %v2462_v62 = vsel %vm244_vm2, %v4342_v61, 0.0  ;;  %v2625_v14 = vpop.permute.xlu1 %2624 }
0x1667   :  { %2463 = vadd.xlane.f32.xlu0 %v2462_v62 }
0x1669   :  { %v4344_v2 = vpop.eup %4343 }
0x166a   :  { %v2465_v3 = vsel %vm244_vm2, %v4344_v2, 0.0 }
0x166b   :  { %2466 = vadd.xlane.f32.xlu0 %v2465_v3 }
0x1681   :  { %2702 = vrot.lane.b32.xlu0 %v5016_v8, %s4530_s6 }
0x16f4   :  { %v2464_v4 = vpop.xlane.xlu0 %2463 }
0x16f5   :  { %4345 = vrcp.f32 %v2464_v4 }
0x16f8   :  { %v2467_v5 = vpop.xlane.xlu0 %2466 }
0x16f9   :  { %4347 = vrcp.f32 %v2467_v5 }
0x16fc   :  { %v2703_v17 = vpop.permute.xlu0 %2702 }
0x16ff   :  { %v4346_v9 = vpop.eup %4345 }
0x1700   :  { %v2470_v11 = vmul.f32 %v4346_v9, %v4342_v61 }
0x1702   :  { %4138 = vmatmul.mubr.msk.f32.vlgmr.msra.gmra.mrb[28].mxu1 %vm244_vm2, %v2470_v11 }
0x1703   :  { %v4348_v12 = vpop.eup %4347  ;;  %4146 = vmatpush3.xpose.msk.msra.mxu1 %vm244_vm2, %v2627_v7  ;;  %4147 = vmatprep.mubr.msk.f32.mxu1 %vm4523_vm1, %v4522_v15 }
0x1704   :  { %v2471_v13 = vmul.f32 %v4348_v12, %v4344_v2  ;;  %4155 = vmatprep.subr.mxu1 %v4522_v15 }
0x1706   :  { %4143 = vmatmul.mubr.msk.f32.vlgmr.msra.gmra.mrb[36].mxu0 %vm244_vm2, %v2471_v13  ;;  %4148 = vmatmul.mubr.msk.f32.vlgmr.msra.gmra.mrb[30].mxu1 %vm244_vm2, %v2625_v14 }
0x1707   :  { %4151 = vmatpush3.xpose.msk.msra.mxu0 %vm244_vm2, %v2705_v10  ;;  %4152 = vmatprep.mubr.msk.f32.mxu0 %vm4523_vm1, %v4522_v15 }
0x1708   :  { %4160 = vmatprep.subr.mxu0 %v4522_v15  ;;  %4157 = vmatprep.mubr.msk.f32.mxu1 %vm4523_vm1, %v4522_v15 }
0x170a   :  { %4153 = vmatmul.mubr.msk.f32.vlgmr.msra.gmra.mrb[38].mxu0 %vm244_vm2, %v2703_v17 }
0x170b   :  { %4162 = vmatprep.mubr.msk.f32.mxu0 %vm4523_vm1, %v4522_v15 }
0x17d5   :  { %v5099_v19 = vpop.f32.mrb[28].mxu1 }
0x17d6   :  { %v4139_v44 = vpop.f32.mrb[29].mxu1 }
0x17d9   :  { %v5101_v20 = vpop.f32.mrb[36].mxu0  ;;  %v2698_v21 = vpop.f32.mrb[30].mxu1 }
0x17da   :  { %v4254_v22 = vpack.i.bf16 %v5101_v20, %v5099_v19  ;;  %v2699_v24 = vadd.f32 %v5108_v23, %v2698_v21  ;;  %v4144_v25 = vpop.f32.mrb[37].mxu0  ;;  %v4149_v27 = vpop.f32.mrb[31].mxu1 }
0x17dc   :  { %v2780_v18 = vsel %vm244_vm2, %v2699_v24, -inf }
0x17dd   :  { %2781 = vmax.xlane.f32.xlu1 %v2780_v18  ;;  %v2776_v43 = vpop.f32.mrb[38].mxu0 }
0x17de   :  { %v2777_v29 = vadd.f32 %v5115_v16, %v2776_v43  ;;  %v4154_v31 = vpop.f32.mrb[39].mxu0  ;;  %v4282_v43 = vld [vmem:[%s5285_s4 + $0x18] sm:$0xff]  }
0x17e0   :  { %v2783_v32 = vsel %vm244_vm2, %v2777_v29, -inf }
0x17e1   :  { %2784 = vmax.xlane.f32.xlu0 %v2783_v32 }
0x17ee   :  { %2802 = vrot.lane.b32.xlu1 %v4997_v63, %s4531_s22 }
0x17f2   :  { %2956 = vrot.lane.b32.xlu1 %v4997_v63, %s4532_s9 }
0x17f6   :  { %3034 = vrot.lane.b32.xlu1 %v4999_v36, %s4532_s9  ;;  %s5306_s9 = smov 24  }
0x17f7   :  { %2878 = vrot.lane.b32.xlu0 %v4999_v36, %s4531_s22 }
0x17fa   :  { %2954 = vrot.lane.b32.xlu1 %v5007_v6, %s4533_s17 }
0x186a   :  { %v2782_v34 = vpop.xlane.xlu1 %2781 }
0x186b   :  { %v2786_v30 = vsub.f32 %v2699_v24, %v2782_v34 }
0x186d   :  { %v2788_v35 = vmul.f32 1.442695, %v2786_v30 }
0x186e   :  { %v2803_v37 = vpop.permute.xlu1 %2802  ;;  %v2785_v33 = vpop.xlane.xlu0 %2784 }
0x186f   :  { %4349 = vpow2.f32 %v2788_v35  ;;  %v2787_v38 = vsub.f32 %v2777_v29, %v2785_v33  ;;  %4156 = vmatpush3.msra.mxu1 %v2803_v37 }
0x1870   :  { %4165 = vmatprep.subr.mxu1 %v4522_v15 }
0x1871   :  { %v2790_v40 = vmul.f32 1.442695, %v2787_v38 }
0x1872   :  { %v2879_v41 = vpop.permute.xlu0 %2878  ;;  %v2957_v51 = vpop.permute.xlu1 %2956 }
0x1873   :  { %4351 = vpow2.f32 %v2790_v40  ;;  %4161 = vmatpush3.msra.mxu0 %v2879_v41 }
0x1874   :  { %4170 = vmatprep.subr.mxu0 %v4522_v15 }
0x1876   :  { %v3035_v53 = vpop.permute.xlu1 %3034 }
0x1879   :  { %v4350_v42 = vpop.eup %4349 }
0x187a   :  { %v2792_v1 = vsel %vm244_vm2, %v4350_v42, 0.0 }
0x187b   :  { %2793 = vadd.xlane.f32.xlu0 %v2792_v1 }
0x187d   :  { %v4352_v6 = vpop.eup %4351 }
0x187e   :  { %v2795_v48 = vsel %vm244_vm2, %v4352_v6, 0.0 }
0x187f   :  { %2796 = vadd.xlane.f32.xlu0 %v2795_v48 }
0x1895   :  { %3032 = vrot.lane.b32.xlu0 %v5016_v8, %s4533_s17  ;;  %v2955_v8 = vpop.permute.xlu1 %2954 }
0x1908   :  { %v2794_v49 = vpop.xlane.xlu0 %2793 }
0x1909   :  { %4353 = vrcp.f32 %v2794_v49 }
0x190c   :  { %v2797_v50 = vpop.xlane.xlu0 %2796 }
0x190d   :  { %4355 = vrcp.f32 %v2797_v50 }
0x1910   :  { %v3033_v47 = vpop.permute.xlu0 %3032 }
0x1913   :  { %v4354_v52 = vpop.eup %4353 }
0x1914   :  { %v2800_v54 = vmul.f32 %v4354_v52, %v4350_v42 }
0x1916   :  { %4158 = vmatmul.mubr.msk.f32.vlgmr.msra.gmra.mrb[32].mxu1 %vm244_vm2, %v2800_v54 }
0x1917   :  { %v4356_v55 = vpop.eup %4355  ;;  %4166 = vmatpush3.xpose.msk.msra.mxu1 %vm244_vm2, %v2957_v51  ;;  %4167 = vmatprep.mubr.msk.f32.mxu1 %vm4523_vm1, %v4522_v15 }
0x1918   :  { %v2801_v45 = vmul.f32 %v4356_v55, %v4352_v6  ;;  %4175 = vmatprep.subr.mxu1 %v4522_v15 }
0x191a   :  { %4163 = vmatmul.mubr.msk.f32.vlgmr.msra.gmra.mrb[40].mxu0 %vm244_vm2, %v2801_v45  ;;  %4168 = vmatmul.mubr.msk.f32.vlgmr.msra.gmra.mrb[34].mxu1 %vm244_vm2, %v2955_v8 }
0x191b   :  { %4171 = vmatpush3.xpose.msk.msra.mxu0 %vm244_vm2, %v3035_v53  ;;  %4172 = vmatprep.mubr.msk.f32.mxu0 %vm4523_vm1, %v4522_v15 }
0x191c   :  { %4180 = vmatprep.subr.mxu0 %v4522_v15  ;;  %4177 = vmatprep.mubr.msk.f32.mxu1 %vm4523_vm1, %v4522_v15 }
0x191e   :  { %4173 = vmatmul.mubr.msk.f32.vlgmr.msra.gmra.mrb[42].mxu0 %vm244_vm2, %v3033_v47 }
0x191f   :  { %4182 = vmatprep.mubr.msk.f32.mxu0 %vm4523_vm1, %v4522_v15 }
0x19e9   :  { %v2874_v39 = vpop.f32.mrb[32].mxu1 }
0x19ea   :  { %v4159_v57 = vpop.f32.mrb[33].mxu1 }
0x19ed   :  { %v2950_v56 = vpop.f32.mrb[40].mxu0  ;;  %v3028_v58 = vpop.f32.mrb[34].mxu1 }
0x19ee   :  { %v4259_v59 = vpack.i.bf16 %v2950_v56, %v2874_v39  ;;  %v3029_v60 = vadd.f32 %v5108_v23, %v3028_v58  ;;  %v4164_v61 = vpop.f32.mrb[41].mxu0  ;;  %v4169_v62 = vpop.f32.mrb[35].mxu1 }
0x19f0   :  { %v3110_v2 = vsel %vm244_vm2, %v3029_v60, -inf }
0x19f1   :  { %3111 = vmax.xlane.f32.xlu1 %v3110_v2  ;;  %v3106_v3 = vpop.f32.mrb[42].mxu0 }
0x19f2   :  { %v3107_v4 = vadd.f32 %v5115_v16, %v3106_v3  ;;  %v4174_v5 = vpop.f32.mrb[43].mxu0 }
0x19f4   :  { %v3113_v7 = vsel %vm244_vm2, %v3107_v4, -inf }
0x19f5   :  { %3114 = vmax.xlane.f32.xlu0 %v3113_v7  ;;  %v4283_v7 = vld [vmem:[%s5289_s8 + $0x10] sm:$0xff]  }
0x1a02   :  { %3132 = vrot.lane.b32.xlu1 %v4997_v63, %s4534_s25 }
0x1a06   :  { %4255 = vrot.lane.b32.xlu1 %v4254_v22, %s5304_s1 }
0x1a0a   :  { %4260 = vrot.lane.b32.xlu1 %v4259_v59, %s5305_s20 }
0x1a7e   :  { %v3112_v9 = vpop.xlane.xlu1 %3111 }
0x1a7f   :  { %v3116_v10 = vsub.f32 %v3029_v60, %v3112_v9  ;;  %v4284_v9 = vld [vmem:[%s5289_s8 + $0x18] sm:$0xff]  }
0x1a81   :  { %v3118_v11 = vmul.f32 1.442695, %v3116_v10  ;;  %v4285_v10 = vld [vmem:[%s5291_s10 + $0x20] sm:$0xff]  }
0x1a82   :  { %v3133_v12 = vpop.permute.xlu1 %3132  ;;  %v3115_v13 = vpop.xlane.xlu0 %3114 }
0x1a83   :  { %4357 = vpow2.f32 %v3118_v11  ;;  %v3117_v14 = vsub.f32 %v3107_v4, %v3115_v13  ;;  %4176 = vmatpush3.msra.mxu1 %v3133_v12  ;;  %v4286_v11 = vld [vmem:[%s5291_s10 + $0x28] sm:$0xff]  }
0x1a84   :  { %4185 = vmatprep.subr.bf16.mxu1 %v4522_v15 }
0x1a85   :  { %v3120_v17 = vmul.f32 1.442695, %v3117_v14 }
0x1a86   :  { %v4256_v30 = vpop.permute.xlu1 %4255 }
0x1a87   :  { %4359 = vpow2.f32 %v3120_v17  ;;  %v4258_v37 = vunpack.i.h.bf16 %v4256_v30  ;;  %v4257_v33 = vunpack.i.l.bf16 %v4256_v30 }
0x1a89   :  { %v3309_v42 = vsel %vm244_vm2, %v5061_v46, %v4258_v37  ;;  %v3308_v1 = vsel %vm244_vm2, %v5059_v0, %v4257_v33  ;;  %v3859_v46 = vld [vmem:[#allocation5 + $0x1] ss:$0 sm:$0xff] }
0x1a8a   :  { %v4261_v35 = vpop.permute.xlu1 %4260 }
0x1a8b   :  { %v4263_v38 = vunpack.i.h.bf16 %v4261_v35  ;;  %v4262_v40 = vunpack.i.l.bf16 %v4261_v35 }
0x1a8d   :  { %v4358_v63 = vpop.eup %4357  ;;  %v3311_v49 = vsel %vm1588_vm3, %v3309_v42, %v4263_v38  ;;  %v3310_v50 = vsel %vm1588_vm3, %v3308_v1, %v4262_v40 }
0x1a8e   :  { %v3122_v44 = vsel %vm244_vm2, %v4358_v63, 0.0 }
0x1a8f   :  { %3123 = vadd.xlane.f32.xlu0 %v3122_v44 }
0x1a91   :  { %v4360_v19 = vpop.eup %4359 }
0x1a92   :  { %v3125_v20 = vsel %vm244_vm2, %v4360_v19, 0.0 }
0x1a93   :  { %3126 = vadd.xlane.f32.xlu0 %v3125_v20 }
0x1aa9   :  { %3208 = vrot.lane.b32.xlu0 %v4999_v36, %s4534_s25  ;;  %v4281_v36 = vld [vmem:[%s5285_s4 + $0x10] sm:$0xff]  }
0x1b1c   :  { %v3124_v21 = vpop.xlane.xlu0 %3123 }
0x1b1d   :  { %4361 = vrcp.f32 %v3124_v21  ;;  %v3863_v21 = vld [vmem:[%s5293_s12 + $0x1] ss:$0 sm:$0xff] }
0x1b20   :  { %v3127_v22 = vpop.xlane.xlu0 %3126 }
0x1b21   :  { %4363 = vrcp.f32 %v3127_v22 }
0x1b24   :  { %v3209_v23 = vpop.permute.xlu0 %3208 }
0x1b25   :  { %4181 = vmatpush3.msra.mxu0 %v3209_v23 }
0x1b26   :  { %4193 = vmatprep.subr.bf16.mxu0 %v4522_v15 }
0x1b27   :  { %v4362_v24 = vpop.eup %4361 }
0x1b28   :  { %v3130_v25 = vmul.f32 %v4362_v24, %v4358_v63 }
0x1b2a   :  { %4178 = vmatmul.mubr.msk.f32.vlgmr.msra.gmra.mrb[36].mxu1 %vm244_vm2, %v3130_v25  ;;  %v3864_v25 = vld [vmem:[%s5294_s13 + $0x1] ss:$0 sm:$0xff] }
0x1b2b   :  { %v4364_v27 = vpop.eup %4363  ;;  %4189 = vmatprep.mubr.msk.bf16.mxu1 %vm4523_vm1, %v4522_v15  ;;  %4186 = vmatpush3.bf16.msra.mxu1 %v4281_v36 }
0x1b2c   :  { %v3131_v18 = vmul.f32 %v4364_v27, %v4360_v19  ;;  %4187 = vmatprep.subr.bf16.mxu1 %v4522_v15 }
0x1b2e   :  { %4183 = vmatmul.mubr.msk.f32.vlgmr.msra.gmra.mrb[44].mxu0 %vm244_vm2, %v3131_v18 }
0x1b2f   :  { %4197 = vmatprep.mubr.msk.bf16.mxu0 %vm4523_vm1, %v4522_v15  ;;  %4188 = vmatpush3.bf16.msra.mxu1 %v4282_v43 }
0x1b30   :  { %4201 = vmatprep.subr.bf16.mxu1 %v4522_v15  ;;  %4194 = vmatpush3.bf16.msra.mxu0 %v4283_v7 }
0x1b31   :  { %4195 = vmatprep.subr.bf16.mxu0 %v4522_v15 }
0x1b34   :  { %4196 = vmatpush3.bf16.msra.mxu0 %v4284_v9 }
0x1bfd   :  { %v3204_v16 = vpop.f32.mrb[36].mxu1 }
0x1bfe   :  { %v4179_v29 = vpop.f32.mrb[37].mxu1 }
0x1bff   :  { %v4288_v29 = vld [vmem:[%s5291_s10 + $0x38] sm:$0xff]  }
0x1c01   :  { %v3280_v31 = vpop.f32.mrb[44].mxu0 }
0x1c02   :  { %v4264_v32 = vpack.i.bf16 %v3280_v31, %v3204_v16  ;;  %v4184_v34 = vpop.f32.mrb[45].mxu0  ;;  %v4287_v16 = vld [vmem:[%s5291_s10 + $0x30] sm:$0xff]  }
0x1c03   :  { %v3869_v31 = vld [vmem:[#allocation10 + $0x1] ss:$0 sm:$0xff] }
0x1c04   :  { %4265 = vrot.lane.b32.xlu1 %v4264_v32, %s5306_s9 }
0x1c76   :  { %v4266_v41 = vpop.permute.xlu1 %4265 }
0x1c77   :  { %v4268_v6 = vunpack.i.h.bf16 %v4266_v41  ;;  %v4267_v48 = vunpack.i.l.bf16 %v4266_v41 }
0x1c79   :  { %v3313_v51 = vsel %vm1591_vm4, %v3311_v49, %v4268_v6  ;;  %v3312_v52 = vsel %vm1591_vm4, %v3310_v50, %v4267_v48 }
0x1c7a   :  { %v3314_v53 = vpack.c.bf16 %v3313_v51, %v3312_v52 }
0x1c7c   :  { %4190 = vmatmul.mubr.msk.bf16.vlgmr.msra.gmra.mrb[40].mxu1 %vm121_vm0, %v3314_v53 }
0x1c7d   :  { %4209 = vmatprep.mubr.msk.bf16.mxu1 %vm4523_vm1, %v4522_v15  ;;  %4202 = vmatpush3.bf16.msra.mxu1 %v4285_v10  ;;  %v3887_v10 = vld [vmem:[%s5295_s14] ss:$0 sm:$0xff]  ;;  %s4538_s14 = smov [#allocation11]  }
0x1c7e   :  { %4203 = vmatprep.subr.bf16.mxu1 %v4522_v15 }
0x1c81   :  { %4204 = vmatpush3.bf16.msra.mxu1 %v4286_v11 }
0x1c82   :  { %4205 = vmatprep.subr.bf16.mxu1 %v4522_v15 }
0x1c85   :  { %4206 = vmatpush3.bf16.msra.mxu1 %v4287_v16 }
0x1c86   :  { %4207 = vmatprep.subr.bf16.mxu1 %v4522_v15  ;;  %v3881_v15 = vld [vmem:[%s5292_s11 + $0x1] ss:$0 sm:$0xff] }
0x1c89   :  { %4208 = vmatpush3.bf16.msra.mxu1 %v4288_v29 }
0x1d4f   :  { %v3374_v54 = vpop.f32.mrb[40].mxu1 }
0x1d50   :  { %v3375_v55 = vadd.f32 %v3859_v46, %v3374_v54  ;;  %v4191_v0 = vpop.f32.mrb[41].mxu1 }
0x1d51   :  { %v3377_v45 = vpop.f32.mrb[42].mxu1 }
0x1d52   :  { %v5195_v8 = vadd.f32 %v3375_v55, %v4970_v26  ;;  %v3378_v47 = vadd.f32 %v3859_v46, %v3377_v45  ;;  %v4192_v39 = vpop.f32.mrb[43].mxu1 }
0x1d54   :  { %v5198_v57 = vadd.f32 %v3378_v47, %v4973_v28  ;;  %v3385_v56 = vsel %vm121_vm0, %v5195_v8, 0.0 }
0x1d55   :  { %3386 = vadd.xlane.f32.xlu0 %v3385_v56 }
0x1d56   :  { %v3388_v58 = vsel %vm121_vm0, %v5198_v57, 0.0 }
0x1d57   :  { %3389 = vadd.xlane.f32.xlu1 %v3388_v58 }
0x1de2   :  { %v3387_v59 = vpop.xlane.xlu0 %3386 }
0x1de3   :  { %v3391_v60 = vmul.f32 0.03125, %v3387_v59 }
0x1de4   :  { %v3390_v61 = vpop.xlane.xlu1 %3389 }
0x1de5   :  { %v3393_v62 = vsub.f32 %v5195_v8, %v3391_v60  ;;  %v3392_v26 = vmul.f32 0.03125, %v3390_v61 }
0x1de7   :  { %v3394_v2 = vsub.f32 %v5198_v57, %v3392_v26  ;;  %v3395_v3 = vmul.f32 %v3393_v62, %v3393_v62 }
0x1de9   :  { %v3397_v28 = vsel %vm121_vm0, %v3395_v3, 0.0  ;;  %v3396_v4 = vmul.f32 %v3394_v2, %v3394_v2  ;;  %v4537_v3 = vmov 1966171168  }
0x1dea   :  { %3398 = vadd.xlane.f32.xlu0 %v3397_v28  ;;  %v3624_v28 = vunpack.c.l.s4 %v4537_v3 }
0x1deb   :  { %v3400_v5 = vsel %vm121_vm0, %v3396_v4, 0.0  ;;  %v3626_v4 = vlaneseq }
0x1ded   :  { %v3627_v7 = vshrl.u32 %v3626_v4, 7 }
0x1dee   :  { %3401 = vadd.xlane.f32.xlu0 %v3400_v5  ;;  %v3625_v5 = vunpack.c.0.s8 %v3624_v28 }
0x1e77   :  { %v3399_v12 = vpop.xlane.xlu0 %3398 }
0x1e78   :  { %v3403_v13 = vmul.f32 0.03125, %v3399_v12 }
0x1e7a   :  { %v3405_v14 = vadd.f32 1e-05, %v3403_v13  ;;  %v3888_v13 = vld [vmem:[%s5296_s15] ss:$0 sm:$0xff]  ;;  %s3759_s15 = sshll.u32 %s4538_s14, 4  ;;  %s3760_s15 = int_to_ptr.vmem [resolvable:$true] %s3759_s15 }
0x1e7b   :  { %v3402_v17 = vpop.xlane.xlu0 %3401  ;;  %s4485_s20 = scalar_lea.vmem %s3760_s15, 256  ;;  %p4490_p13 = scmp.lt.s32.totalorder %s3760_s15, %s3760_s15 }
0x1e7c   :  { %4365 = vrsqrt.f32 %v3405_v14  ;;  %v3404_v63 = vmul.f32 0.03125, %v3402_v17  ;;  %v3628_v14 = vsub.s32 %v3625_v5, %v3627_v7  ;;  %p4486_p12 = scmp.ne.s32.totalorder %s3760_s15, %s4485_s20  ;;  %p4491_p0 = scmp.lt.s32.totalorder %s4485_s20, %s4485_s20 }
0x1e7e   :  { %v3406_v44 = vadd.f32 1e-05, %v3404_v63  ;;  %p4492_p1 = por %p4491_p0, %p4490_p13 }
0x1e80   :  { %4367 = vrsqrt.f32 %v3406_v44  ;;  %p4493_p2 = pnand %p4492_p1, %p4486_p12 }
0x1e86   :  { %v4366_v19 = vpop.eup %4365 }
0x1e87   :  { %v3409_v20 = vmul.f32 %v4366_v19, %v3393_v62 }
0x1e89   :  { %v3415_v23 = vmul.f32 %v3863_v21, %v3409_v20 }
0x1e8a   :  { %v4368_v22 = vpop.eup %4367 }
0x1e8b   :  { %v3410_v24 = vmul.f32 %v4368_v22, %v3394_v2  ;;  %v3421_v18 = vadd.f32 %v3864_v25, %v3415_v23 }
0x1e8d   :  { %v3416_v27 = vmul.f32 %v3863_v21, %v3410_v24 }
0x1e8f   :  { %v3422_v36 = vadd.f32 %v3864_v25, %v3416_v27 }
0x1e91   :  { %v3423_v43 = vpack.c.bf16 %v3422_v36, %v3421_v18 }
0x1e93   :  { %4198 = vmatmul.mubr.msk.bf16.vlgmr.msra.gmra.mrb[48].mxu0 %vm121_vm0, %v3423_v43 }
0x1f66   :  { %v3483_v32 = vpop.f32.mrb[48].mxu0 }
0x1f67   :  { %v3484_v34 = vadd.f32 %v3869_v31, %v3483_v32  ;;  %v4199_v30 = vpop.f32.mrb[49].mxu0 }
0x1f68   :  { %v3486_v35 = vpop.f32.mrb[50].mxu0 }
0x1f69   :  { %v3487_v37 = vadd.f32 %v3869_v31, %v3486_v35  ;;  %v4200_v33 = vpop.f32.mrb[51].mxu0  ;;  %v3490_v38 = vmax.f32 %v3484_v34, 0.0 }
0x1f6b   :  { %v3491_v40 = vmax.f32 %v3487_v37, 0.0 }
0x1f6d   :  { %v3492_v41 = vpack.c.bf16 %v3491_v40, %v3490_v38 }
0x1f6f   :  { %4210 = vmatmul.mubr.msk.bf16.vlgmr.msra.gmra.mrb[44].mxu1 %vm1808_vm5, %v3492_v41 }
0x2042   :  { %v3568_v42 = vpop.f32.mrb[44].mxu1 }
0x2043   :  { %v3569_v1 = vadd.f32 %v3881_v15, %v3568_v42  ;;  %v4211_v6 = vpop.f32.mrb[45].mxu1 }
0x2044   :  { %v3571_v48 = vpop.f32.mrb[46].mxu1 }
0x2045   :  { %v3575_v49 = vadd.f32 %v3569_v1, %v5195_v8  ;;  %v3572_v50 = vadd.f32 %v3881_v15, %v3571_v48  ;;  %v4212_v51 = vpop.f32.mrb[47].mxu1 }
0x2047   :  { %v3576_v52 = vadd.f32 %v3572_v50, %v5198_v57  ;;  %v3579_v53 = vsel %vm121_vm0, %v3575_v49, 0.0 }
0x2048   :  { %3580 = vadd.xlane.f32.xlu0 %v3579_v53 }
0x2049   :  { %v3582_v46 = vsel %vm121_vm0, %v3576_v52, 0.0 }
0x204a   :  { %3583 = vadd.xlane.f32.xlu1 %v3582_v46 }
0x20d5   :  { %v3581_v54 = vpop.xlane.xlu0 %3580 }
0x20d6   :  { %v3585_v55 = vmul.f32 0.03125, %v3581_v54 }
0x20d7   :  { %v3584_v0 = vpop.xlane.xlu1 %3583 }
0x20d8   :  { %v3587_v45 = vsub.f32 %v3575_v49, %v3585_v55  ;;  %v3586_v47 = vmul.f32 0.03125, %v3584_v0 }
0x20da   :  { %v3588_v39 = vsub.f32 %v3576_v52, %v3586_v47  ;;  %v3589_v56 = vmul.f32 %v3587_v45, %v3587_v45 }
0x20dc   :  { %v3591_v58 = vsel %vm121_vm0, %v3589_v56, 0.0  ;;  %v3590_v8 = vmul.f32 %v3588_v39, %v3588_v39 }
0x20dd   :  { %3592 = vadd.xlane.f32.xlu0 %v3591_v58 }
0x20de   :  { %v3594_v59 = vsel %vm121_vm0, %v3590_v8, 0.0 }
0x20df   :  { %3595 = vadd.xlane.f32.xlu1 %v3594_v59 }
0x216a   :  { %v3593_v57 = vpop.xlane.xlu0 %3592 }
0x216b   :  { %v3597_v60 = vmul.f32 0.03125, %v3593_v57 }
0x216c   :  { %v3596_v61 = vpop.xlane.xlu1 %3595 }
0x216d   :  { %v3599_v62 = vadd.f32 1e-05, %v3597_v60  ;;  %v3598_v26 = vmul.f32 0.03125, %v3596_v61 }
0x216f   :  { %4369 = vrsqrt.f32 %v3599_v62  ;;  %v3600_v2 = vadd.f32 1e-05, %v3598_v26 }
0x2171   :  { %4371 = vrsqrt.f32 %v3600_v2 }
0x2179   :  { %v4370_v9 = vpop.eup %4369 }
0x217a   :  { %v3603_v11 = vmul.f32 %v4370_v9, %v3587_v45 }
0x217b   :  { %v4372_v12 = vpop.eup %4371 }
0x217c   :  { %v3611_v17 = vmul.f32 %v3887_v10, %v3603_v11  ;;  %v3604_v63 = vmul.f32 %v4372_v12, %v3588_v39 }
0x217e   :  { %v3619_v44 = vadd.f32 %v3888_v13, %v3611_v17  ;;  %v3612_v19 = vmul.f32 %v3887_v10, %v3604_v63 }
0x2180   :  { %v3622_v20 = vcombine.high %v3619_v44, %v3619_v44  ;;  %v3629_v21 = vrot.slane %v3619_v44, %v3628_v14  ;;  %v3620_v22 = vadd.f32 %v3888_v13, %v3612_v19 }
0x2182   :  { %v3636_v23 = vrot.slane %v3622_v20, %v3628_v14  ;;  %v3637_v24 = vcombine.high %v3629_v21, %v3629_v21  ;;  %v3645_v25 = vrot.slane %v3629_v21, %v3628_v14  ;;  %v3689_v27 = vcombine.high %v3620_v22, %v3620_v22 }
0x2183   :  { %v3696_v18 = vrot.slane %v3620_v22, %v3628_v14 }
0x2184   :  { %v3638_v36 = vcombine.high %v3636_v23, %v3636_v23  ;;  %v3652_v43 = vrot.slane %v3636_v23, %v3628_v14  ;;  %v3659_v16 = vrot.slane %v3637_v24, %v3628_v14  ;;  %v3667_v29 = vcombine.high %v3645_v25, %v3645_v25  ;;  %3680 = vst.msk [vmem:[#allocation11] sm:$0x1] %vm3679_vm6, %v3645_v25 }
0x2185   :  { %v3703_v31 = vrot.slane %v3689_v27, %v3628_v14  ;;  %v3704_v32 = vcombine.high %v3696_v18, %v3696_v18  ;;  %v3712_v34 = vrot.slane %v3696_v18, %v3628_v14 }
0x2186   :  { %v3666_v30 = vrot.slane %v3638_v36, %v3628_v14  ;;  %v3668_v35 = vcombine.high %v3652_v43, %v3652_v43  ;;  %v3669_v37 = vcombine.high %v3659_v16, %v3659_v16  ;;  %3681 = vst.msk [vmem:[#allocation11 + $0x2] sm:$0x1] %vm3679_vm6, %v3659_v16  ;;  %3682 = vst.msk [vmem:[#allocation11 + $0x4] sm:$0x1] %vm3679_vm6, %v3667_v29 }
0x2187   :  { %3684 = vst.msk [vmem:[#allocation11 + $0x8] sm:$0x1] %vm3679_vm6, %v3652_v43  ;;  %v3705_v33 = vcombine.high %v3703_v31, %v3703_v31  ;;  %v3719_v38 = vrot.slane %v3703_v31, %v3628_v14  ;;  %v3726_v40 = vrot.slane %v3704_v32, %v3628_v14  ;;  %v3734_v41 = vcombine.high %v3712_v34, %v3712_v34 }
0x2188   :  { %3746 = vst.msk [vmem:[#allocation11 + $0x1] sm:$0x1] %vm3679_vm6, %v3712_v34  ;;  %v3670_v15 = vcombine.high %v3666_v30, %v3666_v30  ;;  %3683 = vst.msk [vmem:[#allocation11 + $0x6] sm:$0x1] %vm3679_vm6, %v3669_v37 }
0x2189   :  { %3685 = vst.msk [vmem:[#allocation11 + $0xa] sm:$0x1] %vm3679_vm6, %v3666_v30  ;;  %3686 = vst.msk [vmem:[#allocation11 + $0xc] sm:$0x1] %vm3679_vm6, %v3668_v35  ;;  %v3733_v42 = vrot.slane %v3705_v33, %v3628_v14  ;;  %v3735_v1 = vcombine.high %v3719_v38, %v3719_v38  ;;  %v3736_v6 = vcombine.high %v3726_v40, %v3726_v40 }
0x218a   :  { %3747 = vst.msk [vmem:[#allocation11 + $0x3] sm:$0x1] %vm3679_vm6, %v3726_v40  ;;  %3748 = vst.msk [vmem:[#allocation11 + $0x5] sm:$0x1] %vm3679_vm6, %v3734_v41 }
0x218b   :  { %3750 = vst.msk [vmem:[#allocation11 + $0x9] sm:$0x1] %vm3679_vm6, %v3719_v38  ;;  %3687 = vst.msk [vmem:[#allocation11 + $0xe] sm:$0x1] %vm3679_vm6, %v3670_v15  ;;  %v3737_v48 = vcombine.high %v3733_v42, %v3733_v42 }
0x218c   :  { %3749 = vst.msk [vmem:[#allocation11 + $0x7] sm:$0x1] %vm3679_vm6, %v3736_v6  ;;  %3751 = vst.msk [vmem:[#allocation11 + $0xb] sm:$0x1] %vm3679_vm6, %v3733_v42 }
0x218d   :  { %3752 = vst.msk [vmem:[#allocation11 + $0xd] sm:$0x1] %vm3679_vm6, %v3735_v1  ;;  %3753 = vst.msk [vmem:[#allocation11 + $0xf] sm:$0x1] %vm3679_vm6, %v3737_v48 }
0x218e   :  { %4496 = shalt.err (!%p4493_p2)
}
0x218f   :  { %s4497_s6 = scalar_lea.hbm %s5297_s16, 256 }
0x2190   :  { %p4498_p3 = scmp.ne.s32.totalorder %s5297_s16, %s4497_s6  ;;  %p4501_p4 = scmp.lt.u32.totalorder %s4497_s6, %s5297_s16 }
0x2192   :  { %p4503_p5 = pnand %p4501_p4, %p4498_p3 }
0x2194   :  { %4506 = shalt.err (!%p4503_p5)
}
0x2195   :  { %s4539_s25 = smov 32   ;;  %s4540_s28 = smov 2  }
0x2196   :  { %3765 = dma.vmem_to_hbm [thread:$0]  %s3760_s15, 256, %s5297_s16, [#allocation4], %s4539_s25, %s4539_s25, %s4540_s28  }
0x2197   :  { %4513 = dma.done.wait [#allocation4], 256  }
0x2198   :  { %4514 = vsyncadd [#allocation4], 4294967040 }
0x2199   :  { %3769 = vsyncpa [#allocation3], 1 }
0x219a   :  { %3770 = vsyncpa [#allocation6], 1 }
0x219b   :  { %3771 = vsyncpa [#allocation9], 1 }
0x219c   :  { %3772 = vsyncpa [#allocation4], 1 }

</bundles_post_ra>
